<compile_context>
chip_gen: v7x
topology: tpu7x:2x2x1
jax: 0.10.0
libtpu: 0.0.40
codegen_flags: <defaults>
</compile_context>

<pallas_src>
import functools
import math

import jax
import jax.numpy as jnp
from jax import lax
from jax.experimental import pallas as pl
from jax.experimental.pallas import tpu as pltpu

LANE = 128


# ----------------------------- math helpers (in-kernel) -----------------------

def _silu(x):
    return x * (1.0 / (1.0 + jnp.exp(-x)))


def _softplus(x):
    # numerically stable softplus: never evaluates exp of a large positive value.
    return jnp.maximum(x, 0.0) + jnp.log1p(jnp.exp(-jnp.abs(x)))


def _masked_layernorm(x, gamma, beta, n_valid, eps=1e-5):
    """LayerNorm over the last dim where only the first `n_valid` lanes are real
    features; padding lanes are zero on input and gamma/beta are zero there, so
    the output keeps zeros in the padding lanes."""
    d_pad = x.shape[-1]
    inv_n = 1.0 / float(n_valid)
    mu = jnp.sum(x, axis=-1, keepdims=True) * inv_n
    xc = x - mu
    if n_valid != d_pad:
        mask = lax.broadcasted_iota(jnp.int32, x.shape, 1) < n_valid
        xc = jnp.where(mask, xc, 0.0)
    var = jnp.sum(xc * xc, axis=-1, keepdims=True) * inv_n
    return xc * lax.rsqrt(var + eps) * gamma + beta


# ------------------------------ fused per-layer kernel -------------------------

def encoder_layer_kernel(
        x_ref, w_in_ref, convw_ref, convb_ref, w_dtbc_ref, bdt_ref,
        At_ref, Dskip_ref, wout_ref,
        w1_ref, b1_ref, w2_ref, b2_ref,
        g1_ref, be1_ref, g2_ref, be2_ref, *rest,
        seq_len, d_model, d_inner, d_state, d_conv, with_final_norm):
    if with_final_norm:
        gf_ref, bf_ref, o_ref, xpad_scr, da_scr, h_scr = rest
    else:
        o_ref, xpad_scr, da_scr, h_scr = rest

    L, DI, S = seq_len, d_inner, d_state
    f32 = jnp.float32

    x = x_ref[0]                                                     # (L, Dp)

    # ---- Mamba in_proj (packed x || z) -> (L, 2*d_inner) ---------------------
    xz = jnp.dot(x, w_in_ref[...], preferred_element_type=f32)
    xs = xz[:, :DI]
    z = xz[:, DI:]

    # ---- causal depthwise conv1d (kernel d_conv) over the sequence axis ------
    conv_w = convw_ref[...]                                          # (d_conv, DI)
    acc = xs * conv_w[d_conv - 1:d_conv, :] + convb_ref[...]
    if d_conv > 1:
        # single zero-padded scratch, written once, sliced with static offsets
        xpad_scr[0:d_conv - 1, :] = jnp.zeros((d_conv - 1, DI), f32)
        xpad_scr[d_conv - 1:, :] = xs
        for k in range(d_conv - 1):
            acc = acc + xpad_scr[k:k + L, :] * conv_w[k:k + 1, :]
    xc = _silu(acc)                                                  # (L, DI)

    # ---- packed dt / B / C projection ----------------------------------------
    dtbc = jnp.dot(xc, w_dtbc_ref[...], preferred_element_type=f32)  # (L, DI+2S)
    dt = _softplus(dtbc[:, :DI] + bdt_ref[...])                      # (L, DI)
    Bm = dtbc[:, DI:DI + S]                                          # (L, S)
    Cm = dtbc[:, DI + S:DI + 2 * S]                                  # (L, S)

    # ---- hoisted scan inputs, (state, channel) flattened onto lanes ----------
    # da[t, s*DI + c] = exp(dt[t, c] * A[c, s])
    # h_scr is pre-filled with dBx[t, s*DI + c] = dt[t, c] * xc[t, c] * B[t, s]
    # and is overwritten in-place with h_t during the scan (dBx_t is consumed
    # exactly once, in step t, before the overwrite).
    dtxc = dt * xc
    for s in range(S):
        lo = s * DI
        da_scr[:, lo:lo + DI] = jnp.exp(dt * At_ref[s:s + 1, :])
        h_scr[:, lo:lo + DI] = dtxc * Bm[:, s:s + 1]

    # ---- selective scan: h_t = dA_t * h_{t-1} + dBx_t  (loop body: mul+add) ---
    def scan_step(t, h):
        h = da_scr[pl.ds(t, 1), :] * h + h_scr[pl.ds(t, 1), :]
        h_scr[pl.ds(t, 1), :] = h
        return h

    scan_unroll = True if L <= 32 else 8
    lax.fori_loop(0, L, scan_step, jnp.zeros((1, S * DI), f32),
                  unroll=scan_unroll)

    # ---- y_t = <h_t, C_t> + D * x_t, SiLU gate, out_proj ----------------------
    hist = h_scr[...]                                                # (L, S*DI)
    y = xc * Dskip_ref[...]
    for s in range(S):
        lo = s * DI
        y = y + hist[:, lo:lo + DI] * Cm[:, s:s + 1]
    y = y * _silu(z)
    mix = jnp.dot(y, wout_ref[...], preferred_element_type=f32)      # (L, Dp)

    # ---- EncoderLayer: residual + norm1 + 1x1-conv FFN + residual + norm2 -----
    a = x + mix
    a = _masked_layernorm(a, g1_ref[...], be1_ref[...], d_model)
    f = jnp.dot(a, w1_ref[...], preferred_element_type=f32) + b1_ref[...]
    f = jnp.maximum(f, 0.0)                                          # ReLU (dropout = id)
    f = jnp.dot(f, w2_ref[...], preferred_element_type=f32) + b2_ref[...]
    out = _masked_layernorm(a + f, g2_ref[...], be2_ref[...], d_model)

    if with_final_norm:                                              # Encoder.norm fused in
        out = _masked_layernorm(out, gf_ref[...], bf_ref[...], d_model)

    o_ref[0] = out


# ------------------------------ pallas_call wrapper ----------------------------

def _const_index_map(ndim):
    return lambda b: (0,) * ndim


def encoder_layer(x, layer_p, final_norm, *, d_model, d_state, d_conv):
    """One fused EncoderLayer (Mamba + residual/FFN/LayerNorms), gridded over batch."""
    B, L, Dp = x.shape
    d_inner = layer_p["conv_w"].shape[1]
    d_ff = layer_p["w1"].shape[1]

    weights = [layer_p[k] for k in (
        "w_in", "conv_w", "conv_b", "w_dtbc", "b_dt", "A_t", "D_skip", "w_out",
        "w1", "b1", "w2", "b2", "g1", "be1", "g2", "be2")]
    with_final = final_norm is not None
    if with_final:
        weights += [final_norm["g"], final_norm["b"]]

    kernel = functools.partial(
        encoder_layer_kernel, seq_len=L, d_model=d_model, d_inner=d_inner,
        d_state=d_state, d_conv=d_conv, with_final_norm=with_final)

    x_spec = pl.BlockSpec((1, L, Dp), lambda b: (b, 0, 0))
    w_specs = [pl.BlockSpec(w.shape, _const_index_map(w.ndim)) for w in weights]

    flops = 2 * B * L * (Dp * 2 * d_inner + d_inner * (d_inner + 2 * d_state)
                         + d_inner * Dp + 2 * Dp * d_ff) \
        + 10 * B * L * d_inner * d_state
    transcendentals = B * L * d_inner * (d_state + 4)
    bytes_accessed = 4 * (2 * B * L * Dp + sum(int(w.size) for w in weights))

    return pl.pallas_call(
        kernel,
        out_shape=jax.ShapeDtypeStruct((B, L, Dp), jnp.float32),
        grid=(B,),
        in_specs=[x_spec] + w_specs,
        out_specs=x_spec,
        scratch_shapes=[
            pltpu.VMEM((L + d_conv - 1, d_inner), jnp.float32),      # padded conv input
            pltpu.VMEM((L, d_state * d_inner), jnp.float32),         # dA
            pltpu.VMEM((L, d_state * d_inner), jnp.float32),         # dBx, reused as h
        ],
        compiler_params=pltpu.CompilerParams(
            dimension_semantics=("parallel",),
            vmem_limit_bytes=64 * 1024 * 1024),
        cost_estimate=pl.CostEstimate(
            flops=int(flops), transcendentals=int(transcendentals),
            bytes_accessed=int(bytes_accessed)),
    )(x, *weights)


def encoder_forward(x, params):
    """Encoder.forward: mamba layers in sequence, final norm fused into last layer."""
    D = params["d_model"]
    Dp = params["d_model_padded"]
    xp = jnp.pad(x, ((0, 0), (0, 0), (0, Dp - D)))                   # lane-dense padding
    n = len(params["layers"])
    for i, layer in enumerate(params["layers"]):
        final = params["norm"] if i == n - 1 else None
        xp = encoder_layer(xp, layer, final, d_model=D,
                           d_state=params["d_state"], d_conv=params["d_conv"])
    return xp[:, :, :D]


# ------------------------------- parameter init --------------------------------

def init_params(key, num_layers, d_model, d_ff, d_state=8, d_conv=4):
    d_inner = 2 * d_model
    dt_rank = max(1, math.ceil(d_model / 16))
    Dp = ((d_model + LANE - 1) // LANE) * LANE

    def nrm(k, shape, scale=0.02):
        return scale * jax.random.normal(k, shape, jnp.float32)

    def pad_rows(w):
        return jnp.pad(w, ((0, Dp - w.shape[0]), (0, 0)))

    def pad_cols(w):
        return jnp.pad(w, ((0, 0), (0, Dp - w.shape[1])))

    layers = []
    for _ in range(num_layers):
        keys = jax.random.split(key, 12)
        key = keys[0]
        # dt path: x_proj (d_inner -> dt_rank) fused with dt_proj (dt_rank -> d_inner)
        w_dt = jnp.dot(nrm(keys[1], (d_inner, dt_rank), 0.1),
                       nrm(keys[2], (dt_rank, d_inner), 0.5))
        w_B = nrm(keys[3], (d_inner, d_state))
        w_C = nrm(keys[4], (d_inner, d_state))
        w_in_x = nrm(keys[5], (d_model, d_inner))
        w_in_z = nrm(keys[6], (d_model, d_inner))
        # A = -exp(A_log) with S4D-real init, stored transposed as (d_state, d_inner)
        A_t = -jnp.tile(jnp.arange(1, d_state + 1, dtype=jnp.float32)[:, None],
                        (1, d_inner))
        layers.append(dict(
            w_in=pad_rows(jnp.concatenate([w_in_x, w_in_z], axis=1)),    # (Dp, 2*DI)
            conv_w=nrm(keys[7], (d_conv, d_inner), 0.2),
            conv_b=jnp.zeros((1, d_inner), jnp.float32),
            w_dtbc=jnp.concatenate([w_dt, w_B, w_C], axis=1),            # (DI, DI+2S)
            b_dt=jnp.full((1, d_inner), -2.0, jnp.float32),
            A_t=A_t,
            D_skip=jnp.ones((1, d_inner), jnp.float32),
            w_out=pad_cols(nrm(keys[8], (d_inner, d_model))),            # (DI, Dp)
            w1=pad_rows(nrm(keys[9], (d_model, d_ff), 0.05)),            # (Dp, d_ff)
            b1=jnp.zeros((1, d_ff), jnp.float32),
            w2=pad_cols(nrm(keys[10], (d_ff, d_model), 0.05)),           # (d_ff, Dp)
            b2=jnp.zeros((1, Dp), jnp.float32),
            g1=pad_cols(jnp.ones((1, d_model), jnp.float32)),
            be1=jnp.zeros((1, Dp), jnp.float32),
            g2=pad_cols(jnp.ones((1, d_model), jnp.float32)),
            be2=jnp.zeros((1, Dp), jnp.float32),
        ))

    norm = dict(g=pad_cols(jnp.ones((1, d_model), jnp.float32)),
                b=jnp.zeros((1, Dp), jnp.float32))
    return dict(layers=layers, norm=norm, d_model=d_model, d_model_padded=Dp,
                d_state=d_state, d_conv=d_conv)


# ----------------------------------- main ---------------------------------------

if __name__ == "__main__":
    B, L, D, FF = 2, 8, 32, 128
    key = jax.random.PRNGKey(0)
    kx, kp = jax.random.split(key)
    x = jax.random.normal(kx, (B, L, D), jnp.float32)
    params = init_params(kp, num_layers=2, d_model=D, d_ff=FF)

    out = encoder_forward(x, params)
    out = jax.block_until_ready(out)
    assert out.shape == (B, L, D) and bool(jnp.all(jnp.isfinite(out)))
    print("KERNEL_OK")
</pallas_src>

<mosaic_0001>
module attributes {stable_mosaic.version = 11 : i64} {
  func.func @encoder_layer_kernel(%arg0: i32, %arg1: memref<1x8x128xf32, #tpu.memory_space<vmem>>, %arg2: memref<128x128xf32, #tpu.memory_space<vmem>>, %arg3: memref<4x64xf32, #tpu.memory_space<vmem>>, %arg4: memref<1x64xf32, #tpu.memory_space<vmem>>, %arg5: memref<64x80xf32, #tpu.memory_space<vmem>>, %arg6: memref<1x64xf32, #tpu.memory_space<vmem>>, %arg7: memref<8x64xf32, #tpu.memory_space<vmem>>, %arg8: memref<1x64xf32, #tpu.memory_space<vmem>>, %arg9: memref<64x128xf32, #tpu.memory_space<vmem>>, %arg10: memref<128x128xf32, #tpu.memory_space<vmem>>, %arg11: memref<1x128xf32, #tpu.memory_space<vmem>>, %arg12: memref<128x128xf32, #tpu.memory_space<vmem>>, %arg13: memref<1x128xf32, #tpu.memory_space<vmem>>, %arg14: memref<1x128xf32, #tpu.memory_space<vmem>>, %arg15: memref<1x128xf32, #tpu.memory_space<vmem>>, %arg16: memref<1x128xf32, #tpu.memory_space<vmem>>, %arg17: memref<1x128xf32, #tpu.memory_space<vmem>>, %arg18: memref<1x8x128xf32, #tpu.memory_space<vmem>>, %arg19: memref<11x64xf32, #tpu.memory_space<vmem>>, %arg20: memref<8x512xf32, #tpu.memory_space<vmem>>, %arg21: memref<8x512xf32, #tpu.memory_space<vmem>>) attributes {dimension_semantics = [#tpu.dimension_semantics<parallel>], iteration_bounds = array<i64: 2>, scalar_prefetch = 0 : i64, scratch_operands = 3 : i64, tpu.core_type = #tpu.core_type<tc>, window_params = [{transform_indices = @transform_0, window_bounds = array<i64: 1, 8, 128>}, {pipeline_mode = #tpu.pipeline_mode<synchronous>, transform_indices = @transform_1, window_bounds = array<i64: 128, 128>}, {pipeline_mode = #tpu.pipeline_mode<synchronous>, transform_indices = @transform_2, window_bounds = array<i64: 4, 64>}, {pipeline_mode = #tpu.pipeline_mode<synchronous>, transform_indices = @transform_3, window_bounds = array<i64: 1, 64>}, {pipeline_mode = #tpu.pipeline_mode<synchronous>, transform_indices = @transform_4, window_bounds = array<i64: 64, 80>}, {pipeline_mode = #tpu.pipeline_mode<synchronous>, transform_indices = @transform_5, window_bounds = array<i64: 1, 64>}, {pipeline_mode = #tpu.pipeline_mode<synchronous>, transform_indices = @transform_6, window_bounds = array<i64: 8, 64>}, {pipeline_mode = #tpu.pipeline_mode<synchronous>, transform_indices = @transform_7, window_bounds = array<i64: 1, 64>}, {pipeline_mode = #tpu.pipeline_mode<synchronous>, transform_indices = @transform_8, window_bounds = array<i64: 64, 128>}, {pipeline_mode = #tpu.pipeline_mode<synchronous>, transform_indices = @transform_9, window_bounds = array<i64: 128, 128>}, {pipeline_mode = #tpu.pipeline_mode<synchronous>, transform_indices = @transform_10, window_bounds = array<i64: 1, 128>}, {pipeline_mode = #tpu.pipeline_mode<synchronous>, transform_indices = @transform_11, window_bounds = array<i64: 128, 128>}, {pipeline_mode = #tpu.pipeline_mode<synchronous>, transform_indices = @transform_12, window_bounds = array<i64: 1, 128>}, {pipeline_mode = #tpu.pipeline_mode<synchronous>, transform_indices = @transform_13, window_bounds = array<i64: 1, 128>}, {pipeline_mode = #tpu.pipeline_mode<synchronous>, transform_indices = @transform_14, window_bounds = array<i64: 1, 128>}, {pipeline_mode = #tpu.pipeline_mode<synchronous>, transform_indices = @transform_15, window_bounds = array<i64: 1, 128>}, {pipeline_mode = #tpu.pipeline_mode<synchronous>, transform_indices = @transform_16, window_bounds = array<i64: 1, 128>}, {transform_indices = @transform_17, window_bounds = array<i64: 1, 8, 128>}]} {
    %c0 = arith.constant 0 : index
    %c0_0 = arith.constant 0 : index
    %c0_1 = arith.constant 0 : index
    %0 = vector.load %arg1[%c0, %c0_0, %c0_1] : memref<1x8x128xf32, #tpu.memory_space<vmem>>, vector<1x8x128xf32>
    %1 = vector.shape_cast %0 : vector<1x8x128xf32> to vector<8x128xf32>
    %c0_2 = arith.constant 0 : index
    %c0_3 = arith.constant 0 : index
    %2 = vector.load %arg2[%c0_2, %c0_3] : memref<128x128xf32, #tpu.memory_space<vmem>>, vector<128x128xf32>
    %cst = arith.constant dense<0.000000e+00> : vector<8x128xf32>
    %3 = tpu.matmul %1, %2, %cst {dimension_numbers = #tpu.dot_dimension_numbers<[1], [0], [0], [1], [0, 0, 1, 1], [], []>} : vector<8x128xf32>, vector<128x128xf32>, vector<8x128xf32> -> vector<8x128xf32>
    %4 = vector.extract_strided_slice %3 {offsets = [0, 0], sizes = [8, 64], strides = [1, 1]} : vector<8x128xf32> to vector<8x64xf32>
    %5 = vector.extract_strided_slice %3 {offsets = [0, 64], sizes = [8, 64], strides = [1, 1]} : vector<8x128xf32> to vector<8x64xf32>
    %c0_4 = arith.constant 0 : index
    %c0_5 = arith.constant 0 : index
    %6 = vector.load %arg3[%c0_4, %c0_5] : memref<4x64xf32, #tpu.memory_space<vmem>>, vector<4x64xf32>
    %7 = vector.extract_strided_slice %6 {offsets = [3, 0], sizes = [1, 64], strides = [1, 1]} : vector<4x64xf32> to vector<1x64xf32>
    %8 = vector.broadcast %7 : vector<1x64xf32> to vector<8x64xf32>
    %9 = arith.mulf %4, %8 : vector<8x64xf32>
    %c0_6 = arith.constant 0 : index
    %c0_7 = arith.constant 0 : index
    %10 = vector.load %arg4[%c0_6, %c0_7] : memref<1x64xf32, #tpu.memory_space<vmem>>, vector<1x64xf32>
    %11 = vector.broadcast %10 : vector<1x64xf32> to vector<8x64xf32>
    %12 = arith.addf %9, %11 : vector<8x64xf32>
    %cst_8 = arith.constant 0.000000e+00 : f32
    %13 = vector.broadcast %cst_8 : f32 to vector<3x64xf32>
    %c0_9 = arith.constant 0 : index
    %c0_10 = arith.constant 0 : index
    %14 = vector.load %arg19[%c0_9, %c0_10] : memref<11x64xf32, #tpu.memory_space<vmem>>, vector<3x64xf32>
    tpu.vector_store %arg19[%c0_9, %c0_10], %13 {strides = array<i32>} : memref<11x64xf32, #tpu.memory_space<vmem>>, vector<3x64xf32>,
    %c3 = arith.constant 3 : index
    %c0_11 = arith.constant 0 : index
    %15 = vector.load %arg19[%c3, %c0_11] : memref<11x64xf32, #tpu.memory_space<vmem>>, vector<8x64xf32>
    tpu.vector_store %arg19[%c3, %c0_11], %4 {strides = array<i32>} : memref<11x64xf32, #tpu.memory_space<vmem>>, vector<8x64xf32>,
    %c0_12 = arith.constant 0 : index
    %c0_13 = arith.constant 0 : index
    %16 = vector.load %arg19[%c0_12, %c0_13] : memref<11x64xf32, #tpu.memory_space<vmem>>, vector<8x64xf32>
    %17 = vector.extract_strided_slice %6 {offsets = [0, 0], sizes = [1, 64], strides = [1, 1]} : vector<4x64xf32> to vector<1x64xf32>
    %18 = vector.broadcast %17 : vector<1x64xf32> to vector<8x64xf32>
    %19 = arith.mulf %16, %18 : vector<8x64xf32>
    %20 = arith.addf %12, %19 : vector<8x64xf32>
    %c1 = arith.constant 1 : index
    %c0_14 = arith.constant 0 : index
    %21 = vector.load %arg19[%c1, %c0_14] : memref<11x64xf32, #tpu.memory_space<vmem>>, vector<8x64xf32>
    %22 = vector.extract_strided_slice %6 {offsets = [1, 0], sizes = [1, 64], strides = [1, 1]} : vector<4x64xf32> to vector<1x64xf32>
    %23 = vector.broadcast %22 : vector<1x64xf32> to vector<8x64xf32>
    %24 = arith.mulf %21, %23 : vector<8x64xf32>
    %25 = arith.addf %20, %24 : vector<8x64xf32>
    %c2 = arith.constant 2 : index
    %c0_15 = arith.constant 0 : index
    %26 = vector.load %arg19[%c2, %c0_15] : memref<11x64xf32, #tpu.memory_space<vmem>>, vector<8x64xf32>
    %27 = vector.extract_strided_slice %6 {offsets = [2, 0], sizes = [1, 64], strides = [1, 1]} : vector<4x64xf32> to vector<1x64xf32>
    %28 = vector.broadcast %27 : vector<1x64xf32> to vector<8x64xf32>
    %29 = arith.mulf %26, %28 : vector<8x64xf32>
    %30 = arith.addf %25, %29 : vector<8x64xf32>
    %cst_16 = arith.constant 0.000000e+00 : f32
    %31 = vector.broadcast %cst_16 : f32 to vector<8x64xf32>
    %32 = arith.subf %31, %30 : vector<8x64xf32>
    %33 = math.exp %32 : vector<8x64xf32>
    %cst_17 = arith.constant 1.000000e+00 : f32
    %34 = vector.broadcast %cst_17 : f32 to vector<8x64xf32>
    %35 = arith.addf %34, %33 : vector<8x64xf32>
    %cst_18 = arith.constant 1.000000e+00 : f32
    %36 = vector.broadcast %cst_18 : f32 to vector<8x64xf32>
    %37 = arith.divf %36, %35 : vector<8x64xf32>
    %38 = arith.mulf %30, %37 : vector<8x64xf32>
    %c0_19 = arith.constant 0 : index
    %c0_20 = arith.constant 0 : index
    %39 = vector.load %arg5[%c0_19, %c0_20] : memref<64x80xf32, #tpu.memory_space<vmem>>, vector<64x80xf32>
    %cst_21 = arith.constant dense<0.000000e+00> : vector<8x80xf32>
    %40 = tpu.matmul %38, %39, %cst_21 {dimension_numbers = #tpu.dot_dimension_numbers<[1], [0], [0], [1], [0, 0, 1, 1], [], []>} : vector<8x64xf32>, vector<64x80xf32>, vector<8x80xf32> -> vector<8x80xf32>
    %41 = vector.extract_strided_slice %40 {offsets = [0, 0], sizes = [8, 64], strides = [1, 1]} : vector<8x80xf32> to vector<8x64xf32>
    %c0_22 = arith.constant 0 : index
    %c0_23 = arith.constant 0 : index
    %42 = vector.load %arg6[%c0_22, %c0_23] : memref<1x64xf32, #tpu.memory_space<vmem>>, vector<1x64xf32>
    %43 = vector.broadcast %42 : vector<1x64xf32> to vector<8x64xf32>
    %44 = arith.addf %41, %43 : vector<8x64xf32>
    %cst_24 = arith.constant 0.000000e+00 : f32
    %45 = vector.broadcast %cst_24 : f32 to vector<8x64xf32>
    %46 = arith.maximumf %44, %45 : vector<8x64xf32>
    %47 = math.absf %44 : vector<8x64xf32>
    %cst_25 = arith.constant 0.000000e+00 : f32
    %48 = vector.broadcast %cst_25 : f32 to vector<8x64xf32>
    %49 = arith.subf %48, %47 : vector<8x64xf32>
    %50 = math.exp %49 : vector<8x64xf32>
    %51 = math.log1p %50 : vector<8x64xf32>
    %52 = arith.addf %46, %51 : vector<8x64xf32>
    %53 = vector.extract_strided_slice %40 {offsets = [0, 64], sizes = [8, 8], strides = [1, 1]} : vector<8x80xf32> to vector<8x8xf32>
    %54 = vector.extract_strided_slice %40 {offsets = [0, 72], sizes = [8, 8], strides = [1, 1]} : vector<8x80xf32> to vector<8x8xf32>
    %55 = arith.mulf %52, %38 : vector<8x64xf32>
    %c0_26 = arith.constant 0 : index
    %c0_27 = arith.constant 0 : index
    %56 = vector.load %arg7[%c0_26, %c0_27] : memref<8x64xf32, #tpu.memory_space<vmem>>, vector<1x64xf32>
    %57 = vector.broadcast %56 : vector<1x64xf32> to vector<8x64xf32>
    %58 = arith.mulf %52, %57 : vector<8x64xf32>
    %59 = math.exp %58 : vector<8x64xf32>
    %c0_28 = arith.constant 0 : index
    %c0_29 = arith.constant 0 : index
    %60 = vector.load %arg20[%c0_28, %c0_29] : memref<8x512xf32, #tpu.memory_space<vmem>>, vector<8x64xf32>
    tpu.vector_store %arg20[%c0_28, %c0_29], %59 {strides = array<i32>} : memref<8x512xf32, #tpu.memory_space<vmem>>, vector<8x64xf32>,
    %61 = vector.extract_strided_slice %53 {offsets = [0, 0], sizes = [8, 1], strides = [1, 1]} : vector<8x8xf32> to vector<8x1xf32>
    %62 = vector.broadcast %61 : vector<8x1xf32> to vector<8x64xf32>
    %63 = arith.mulf %55, %62 : vector<8x64xf32>
    %c0_30 = arith.constant 0 : index
    %c0_31 = arith.constant 0 : index
    %64 = vector.load %arg21[%c0_30, %c0_31] : memref<8x512xf32, #tpu.memory_space<vmem>>, vector<8x64xf32>
    tpu.vector_store %arg21[%c0_30, %c0_31], %63 {strides = array<i32>} : memref<8x512xf32, #tpu.memory_space<vmem>>, vector<8x64xf32>,
    %c1_32 = arith.constant 1 : index
    %c0_33 = arith.constant 0 : index
    %65 = vector.load %arg7[%c1_32, %c0_33] : memref<8x64xf32, #tpu.memory_space<vmem>>, vector<1x64xf32>
    %66 = vector.broadcast %65 : vector<1x64xf32> to vector<8x64xf32>
    %67 = arith.mulf %52, %66 : vector<8x64xf32>
    %68 = math.exp %67 : vector<8x64xf32>
    %c0_34 = arith.constant 0 : index
    %c64 = arith.constant 64 : index
    %69 = vector.load %arg20[%c0_34, %c64] : memref<8x512xf32, #tpu.memory_space<vmem>>, vector<8x64xf32>
    tpu.vector_store %arg20[%c0_34, %c64], %68 {strides = array<i32>} : memref<8x512xf32, #tpu.memory_space<vmem>>, vector<8x64xf32>,
    %70 = vector.extract_strided_slice %53 {offsets = [0, 1], sizes = [8, 1], strides = [1, 1]} : vector<8x8xf32> to vector<8x1xf32>
    %71 = vector.broadcast %70 : vector<8x1xf32> to vector<8x64xf32>
    %72 = arith.mulf %55, %71 : vector<8x64xf32>
    %c0_35 = arith.constant 0 : index
    %c64_36 = arith.constant 64 : index
    %73 = vector.load %arg21[%c0_35, %c64_36] : memref<8x512xf32, #tpu.memory_space<vmem>>, vector<8x64xf32>
    tpu.vector_store %arg21[%c0_35, %c64_36], %72 {strides = array<i32>} : memref<8x512xf32, #tpu.memory_space<vmem>>, vector<8x64xf32>,
    %c2_37 = arith.constant 2 : index
    %c0_38 = arith.constant 0 : index
    %74 = vector.load %arg7[%c2_37, %c0_38] : memref<8x64xf32, #tpu.memory_space<vmem>>, vector<1x64xf32>
    %75 = vector.broadcast %74 : vector<1x64xf32> to vector<8x64xf32>
    %76 = arith.mulf %52, %75 : vector<8x64xf32>
    %77 = math.exp %76 : vector<8x64xf32>
    %c0_39 = arith.constant 0 : index
    %c128 = arith.constant 128 : index
    %78 = vector.load %arg20[%c0_39, %c128] : memref<8x512xf32, #tpu.memory_space<vmem>>, vector<8x64xf32>
    tpu.vector_store %arg20[%c0_39, %c128], %77 {strides = array<i32>} : memref<8x512xf32, #tpu.memory_space<vmem>>, vector<8x64xf32>,
    %79 = vector.extract_strided_slice %53 {offsets = [0, 2], sizes = [8, 1], strides = [1, 1]} : vector<8x8xf32> to vector<8x1xf32>
    %80 = vector.broadcast %79 : vector<8x1xf32> to vector<8x64xf32>
    %81 = arith.mulf %55, %80 : vector<8x64xf32>
    %c0_40 = arith.constant 0 : index
    %c128_41 = arith.constant 128 : index
    %82 = vector.load %arg21[%c0_40, %c128_41] : memref<8x512xf32, #tpu.memory_space<vmem>>, vector<8x64xf32>
    tpu.vector_store %arg21[%c0_40, %c128_41], %81 {strides = array<i32>} : memref<8x512xf32, #tpu.memory_space<vmem>>, vector<8x64xf32>,
    %c3_42 = arith.constant 3 : index
    %c0_43 = arith.constant 0 : index
    %83 = vector.load %arg7[%c3_42, %c0_43] : memref<8x64xf32, #tpu.memory_space<vmem>>, vector<1x64xf32>
    %84 = vector.broadcast %83 : vector<1x64xf32> to vector<8x64xf32>
    %85 = arith.mulf %52, %84 : vector<8x64xf32>
    %86 = math.exp %85 : vector<8x64xf32>
    %c0_44 = arith.constant 0 : index
    %c192 = arith.constant 192 : index
    %87 = vector.load %arg20[%c0_44, %c192] : memref<8x512xf32, #tpu.memory_space<vmem>>, vector<8x64xf32>
    tpu.vector_store %arg20[%c0_44, %c192], %86 {strides = array<i32>} : memref<8x512xf32, #tpu.memory_space<vmem>>, vector<8x64xf32>,
    %88 = vector.extract_strided_slice %53 {offsets = [0, 3], sizes = [8, 1], strides = [1, 1]} : vector<8x8xf32> to vector<8x1xf32>
    %89 = vector.broadcast %88 : vector<8x1xf32> to vector<8x64xf32>
    %90 = arith.mulf %55, %89 : vector<8x64xf32>
    %c0_45 = arith.constant 0 : index
    %c192_46 = arith.constant 192 : index
    %91 = vector.load %arg21[%c0_45, %c192_46] : memref<8x512xf32, #tpu.memory_space<vmem>>, vector<8x64xf32>
    tpu.vector_store %arg21[%c0_45, %c192_46], %90 {strides = array<i32>} : memref<8x512xf32, #tpu.memory_space<vmem>>, vector<8x64xf32>,
    %c4 = arith.constant 4 : index
    %c0_47 = arith.constant 0 : index
    %92 = vector.load %arg7[%c4, %c0_47] : memref<8x64xf32, #tpu.memory_space<vmem>>, vector<1x64xf32>
    %93 = vector.broadcast %92 : vector<1x64xf32> to vector<8x64xf32>
    %94 = arith.mulf %52, %93 : vector<8x64xf32>
    %95 = math.exp %94 : vector<8x64xf32>
    %c0_48 = arith.constant 0 : index
    %c256 = arith.constant 256 : index
    %96 = vector.load %arg20[%c0_48, %c256] : memref<8x512xf32, #tpu.memory_space<vmem>>, vector<8x64xf32>
    tpu.vector_store %arg20[%c0_48, %c256], %95 {strides = array<i32>} : memref<8x512xf32, #tpu.memory_space<vmem>>, vector<8x64xf32>,
    %97 = vector.extract_strided_slice %53 {offsets = [0, 4], sizes = [8, 1], strides = [1, 1]} : vector<8x8xf32> to vector<8x1xf32>
    %98 = vector.broadcast %97 : vector<8x1xf32> to vector<8x64xf32>
    %99 = arith.mulf %55, %98 : vector<8x64xf32>
    %c0_49 = arith.constant 0 : index
    %c256_50 = arith.constant 256 : index
    %100 = vector.load %arg21[%c0_49, %c256_50] : memref<8x512xf32, #tpu.memory_space<vmem>>, vector<8x64xf32>
    tpu.vector_store %arg21[%c0_49, %c256_50], %99 {strides = array<i32>} : memref<8x512xf32, #tpu.memory_space<vmem>>, vector<8x64xf32>,
    %c5 = arith.constant 5 : index
    %c0_51 = arith.constant 0 : index
    %101 = vector.load %arg7[%c5, %c0_51] : memref<8x64xf32, #tpu.memory_space<vmem>>, vector<1x64xf32>
    %102 = vector.broadcast %101 : vector<1x64xf32> to vector<8x64xf32>
    %103 = arith.mulf %52, %102 : vector<8x64xf32>
    %104 = math.exp %103 : vector<8x64xf32>
    %c0_52 = arith.constant 0 : index
    %c320 = arith.constant 320 : index
    %105 = vector.load %arg20[%c0_52, %c320] : memref<8x512xf32, #tpu.memory_space<vmem>>, vector<8x64xf32>
    tpu.vector_store %arg20[%c0_52, %c320], %104 {strides = array<i32>} : memref<8x512xf32, #tpu.memory_space<vmem>>, vector<8x64xf32>,
    %106 = vector.extract_strided_slice %53 {offsets = [0, 5], sizes = [8, 1], strides = [1, 1]} : vector<8x8xf32> to vector<8x1xf32>
    %107 = vector.broadcast %106 : vector<8x1xf32> to vector<8x64xf32>
    %108 = arith.mulf %55, %107 : vector<8x64xf32>
    %c0_53 = arith.constant 0 : index
    %c320_54 = arith.constant 320 : index
    %109 = vector.load %arg21[%c0_53, %c320_54] : memref<8x512xf32, #tpu.memory_space<vmem>>, vector<8x64xf32>
    tpu.vector_store %arg21[%c0_53, %c320_54], %108 {strides = array<i32>} : memref<8x512xf32, #tpu.memory_space<vmem>>, vector<8x64xf32>,
    %c6 = arith.constant 6 : index
    %c0_55 = arith.constant 0 : index
    %110 = vector.load %arg7[%c6, %c0_55] : memref<8x64xf32, #tpu.memory_space<vmem>>, vector<1x64xf32>
    %111 = vector.broadcast %110 : vector<1x64xf32> to vector<8x64xf32>
    %112 = arith.mulf %52, %111 : vector<8x64xf32>
    %113 = math.exp %112 : vector<8x64xf32>
    %c0_56 = arith.constant 0 : index
    %c384 = arith.constant 384 : index
    %114 = vector.load %arg20[%c0_56, %c384] : memref<8x512xf32, #tpu.memory_space<vmem>>, vector<8x64xf32>
    tpu.vector_store %arg20[%c0_56, %c384], %113 {strides = array<i32>} : memref<8x512xf32, #tpu.memory_space<vmem>>, vector<8x64xf32>,
    %115 = vector.extract_strided_slice %53 {offsets = [0, 6], sizes = [8, 1], strides = [1, 1]} : vector<8x8xf32> to vector<8x1xf32>
    %116 = vector.broadcast %115 : vector<8x1xf32> to vector<8x64xf32>
    %117 = arith.mulf %55, %116 : vector<8x64xf32>
    %c0_57 = arith.constant 0 : index
    %c384_58 = arith.constant 384 : index
    %118 = vector.load %arg21[%c0_57, %c384_58] : memref<8x512xf32, #tpu.memory_space<vmem>>, vector<8x64xf32>
    tpu.vector_store %arg21[%c0_57, %c384_58], %117 {strides = array<i32>} : memref<8x512xf32, #tpu.memory_space<vmem>>, vector<8x64xf32>,
    %c7 = arith.constant 7 : index
    %c0_59 = arith.constant 0 : index
    %119 = vector.load %arg7[%c7, %c0_59] : memref<8x64xf32, #tpu.memory_space<vmem>>, vector<1x64xf32>
    %120 = vector.broadcast %119 : vector<1x64xf32> to vector<8x64xf32>
    %121 = arith.mulf %52, %120 : vector<8x64xf32>
    %122 = math.exp %121 : vector<8x64xf32>
    %c0_60 = arith.constant 0 : index
    %c448 = arith.constant 448 : index
    %123 = vector.load %arg20[%c0_60, %c448] : memref<8x512xf32, #tpu.memory_space<vmem>>, vector<8x64xf32>
    tpu.vector_store %arg20[%c0_60, %c448], %122 {strides = array<i32>} : memref<8x512xf32, #tpu.memory_space<vmem>>, vector<8x64xf32>,
    %124 = vector.extract_strided_slice %53 {offsets = [0, 7], sizes = [8, 1], strides = [1, 1]} : vector<8x8xf32> to vector<8x1xf32>
    %125 = vector.broadcast %124 : vector<8x1xf32> to vector<8x64xf32>
    %126 = arith.mulf %55, %125 : vector<8x64xf32>
    %c0_61 = arith.constant 0 : index
    %c448_62 = arith.constant 448 : index
    %127 = vector.load %arg21[%c0_61, %c448_62] : memref<8x512xf32, #tpu.memory_space<vmem>>, vector<8x64xf32>
    tpu.vector_store %arg21[%c0_61, %c448_62], %126 {strides = array<i32>} : memref<8x512xf32, #tpu.memory_space<vmem>>, vector<8x64xf32>,
    %cst_63 = arith.constant 0.000000e+00 : f32
    %128 = vector.broadcast %cst_63 : f32 to vector<1x512xf32>
    %c0_i32 = arith.constant 0 : i32
    %129 = arith.index_cast %c0_i32 : i32 to index
    %c0_64 = arith.constant 0 : index
    %130 = vector.load %arg20[%129, %c0_64] : memref<8x512xf32, #tpu.memory_space<vmem>>, vector<1x512xf32>
    %131 = arith.mulf %130, %128 : vector<1x512xf32>
    %132 = arith.index_cast %c0_i32 : i32 to index
    %c0_65 = arith.constant 0 : index
    %133 = vector.load %arg21[%132, %c0_65] : memref<8x512xf32, #tpu.memory_space<vmem>>, vector<1x512xf32>
    %134 = arith.addf %131, %133 : vector<1x512xf32>
    %135 = arith.index_cast %c0_i32 : i32 to index
    %c0_66 = arith.constant 0 : index
    %136 = vector.load %arg21[%135, %c0_66] : memref<8x512xf32, #tpu.memory_space<vmem>>, vector<1x512xf32>
    tpu.vector_store %arg21[%135, %c0_66], %134 {strides = array<i32>} : memref<8x512xf32, #tpu.memory_space<vmem>>, vector<1x512xf32>,
    %c1_i32 = arith.constant 1 : i32
    %137 = arith.index_cast %c1_i32 : i32 to index
    %c0_67 = arith.constant 0 : index
    %138 = vector.load %arg20[%137, %c0_67] : memref<8x512xf32, #tpu.memory_space<vmem>>, vector<1x512xf32>
    %139 = arith.mulf %138, %134 : vector<1x512xf32>
    %140 = arith.index_cast %c1_i32 : i32 to index
    %c0_68 = arith.constant 0 : index
    %141 = vector.load %arg21[%140, %c0_68] : memref<8x512xf32, #tpu.memory_space<vmem>>, vector<1x512xf32>
    %142 = arith.addf %139, %141 : vector<1x512xf32>
    %143 = arith.index_cast %c1_i32 : i32 to index
    %c0_69 = arith.constant 0 : index
    %144 = vector.load %arg21[%143, %c0_69] : memref<8x512xf32, #tpu.memory_space<vmem>>, vector<1x512xf32>
    tpu.vector_store %arg21[%143, %c0_69], %142 {strides = array<i32>} : memref<8x512xf32, #tpu.memory_space<vmem>>, vector<1x512xf32>,
    %c2_i32 = arith.constant 2 : i32
    %145 = arith.index_cast %c2_i32 : i32 to index
    %c0_70 = arith.constant 0 : index
    %146 = vector.load %arg20[%145, %c0_70] : memref<8x512xf32, #tpu.memory_space<vmem>>, vector<1x512xf32>
    %147 = arith.mulf %146, %142 : vector<1x512xf32>
    %148 = arith.index_cast %c2_i32 : i32 to index
    %c0_71 = arith.constant 0 : index
    %149 = vector.load %arg21[%148, %c0_71] : memref<8x512xf32, #tpu.memory_space<vmem>>, vector<1x512xf32>
    %150 = arith.addf %147, %149 : vector<1x512xf32>
    %151 = arith.index_cast %c2_i32 : i32 to index
    %c0_72 = arith.constant 0 : index
    %152 = vector.load %arg21[%151, %c0_72] : memref<8x512xf32, #tpu.memory_space<vmem>>, vector<1x512xf32>
    tpu.vector_store %arg21[%151, %c0_72], %150 {strides = array<i32>} : memref<8x512xf32, #tpu.memory_space<vmem>>, vector<1x512xf32>,
    %c3_i32 = arith.constant 3 : i32
    %153 = arith.index_cast %c3_i32 : i32 to index
    %c0_73 = arith.constant 0 : index
    %154 = vector.load %arg20[%153, %c0_73] : memref<8x512xf32, #tpu.memory_space<vmem>>, vector<1x512xf32>
    %155 = arith.mulf %154, %150 : vector<1x512xf32>
    %156 = arith.index_cast %c3_i32 : i32 to index
    %c0_74 = arith.constant 0 : index
    %157 = vector.load %arg21[%156, %c0_74] : memref<8x512xf32, #tpu.memory_space<vmem>>, vector<1x512xf32>
    %158 = arith.addf %155, %157 : vector<1x512xf32>
    %159 = arith.index_cast %c3_i32 : i32 to index
    %c0_75 = arith.constant 0 : index
    %160 = vector.load %arg21[%159, %c0_75] : memref<8x512xf32, #tpu.memory_space<vmem>>, vector<1x512xf32>
    tpu.vector_store %arg21[%159, %c0_75], %158 {strides = array<i32>} : memref<8x512xf32, #tpu.memory_space<vmem>>, vector<1x512xf32>,
    %c4_i32 = arith.constant 4 : i32
    %161 = arith.index_cast %c4_i32 : i32 to index
    %c0_76 = arith.constant 0 : index
    %162 = vector.load %arg20[%161, %c0_76] : memref<8x512xf32, #tpu.memory_space<vmem>>, vector<1x512xf32>
    %163 = arith.mulf %162, %158 : vector<1x512xf32>
    %164 = arith.index_cast %c4_i32 : i32 to index
    %c0_77 = arith.constant 0 : index
    %165 = vector.load %arg21[%164, %c0_77] : memref<8x512xf32, #tpu.memory_space<vmem>>, vector<1x512xf32>
    %166 = arith.addf %163, %165 : vector<1x512xf32>
    %167 = arith.index_cast %c4_i32 : i32 to index
    %c0_78 = arith.constant 0 : index
    %168 = vector.load %arg21[%167, %c0_78] : memref<8x512xf32, #tpu.memory_space<vmem>>, vector<1x512xf32>
    tpu.vector_store %arg21[%167, %c0_78], %166 {strides = array<i32>} : memref<8x512xf32, #tpu.memory_space<vmem>>, vector<1x512xf32>,
    %c5_i32 = arith.constant 5 : i32
    %169 = arith.index_cast %c5_i32 : i32 to index
    %c0_79 = arith.constant 0 : index
    %170 = vector.load %arg20[%169, %c0_79] : memref<8x512xf32, #tpu.memory_space<vmem>>, vector<1x512xf32>
    %171 = arith.mulf %170, %166 : vector<1x512xf32>
    %172 = arith.index_cast %c5_i32 : i32 to index
    %c0_80 = arith.constant 0 : index
    %173 = vector.load %arg21[%172, %c0_80] : memref<8x512xf32, #tpu.memory_space<vmem>>, vector<1x512xf32>
    %174 = arith.addf %171, %173 : vector<1x512xf32>
    %175 = arith.index_cast %c5_i32 : i32 to index
    %c0_81 = arith.constant 0 : index
    %176 = vector.load %arg21[%175, %c0_81] : memref<8x512xf32, #tpu.memory_space<vmem>>, vector<1x512xf32>
    tpu.vector_store %arg21[%175, %c0_81], %174 {strides = array<i32>} : memref<8x512xf32, #tpu.memory_space<vmem>>, vector<1x512xf32>,
    %c6_i32 = arith.constant 6 : i32
    %177 = arith.index_cast %c6_i32 : i32 to index
    %c0_82 = arith.constant 0 : index
    %178 = vector.load %arg20[%177, %c0_82] : memref<8x512xf32, #tpu.memory_space<vmem>>, vector<1x512xf32>
    %179 = arith.mulf %178, %174 : vector<1x512xf32>
    %180 = arith.index_cast %c6_i32 : i32 to index
    %c0_83 = arith.constant 0 : index
    %181 = vector.load %arg21[%180, %c0_83] : memref<8x512xf32, #tpu.memory_space<vmem>>, vector<1x512xf32>
    %182 = arith.addf %179, %181 : vector<1x512xf32>
    %183 = arith.index_cast %c6_i32 : i32 to index
    %c0_84 = arith.constant 0 : index
    %184 = vector.load %arg21[%183, %c0_84] : memref<8x512xf32, #tpu.memory_space<vmem>>, vector<1x512xf32>
    tpu.vector_store %arg21[%183, %c0_84], %182 {strides = array<i32>} : memref<8x512xf32, #tpu.memory_space<vmem>>, vector<1x512xf32>,
    %c7_i32 = arith.constant 7 : i32
    %185 = arith.index_cast %c7_i32 : i32 to index
    %c0_85 = arith.constant 0 : index
    %186 = vector.load %arg20[%185, %c0_85] : memref<8x512xf32, #tpu.memory_space<vmem>>, vector<1x512xf32>
    %187 = arith.mulf %186, %182 : vector<1x512xf32>
    %188 = arith.index_cast %c7_i32 : i32 to index
    %c0_86 = arith.constant 0 : index
    %189 = vector.load %arg21[%188, %c0_86] : memref<8x512xf32, #tpu.memory_space<vmem>>, vector<1x512xf32>
    %190 = arith.addf %187, %189 : vector<1x512xf32>
    %191 = arith.index_cast %c7_i32 : i32 to index
    %c0_87 = arith.constant 0 : index
    %192 = vector.load %arg21[%191, %c0_87] : memref<8x512xf32, #tpu.memory_space<vmem>>, vector<1x512xf32>
    tpu.vector_store %arg21[%191, %c0_87], %190 {strides = array<i32>} : memref<8x512xf32, #tpu.memory_space<vmem>>, vector<1x512xf32>,
    %c8_i32 = arith.constant 8 : i32
    %c0_88 = arith.constant 0 : index
    %c0_89 = arith.constant 0 : index
    %193 = vector.load %arg21[%c0_88, %c0_89] : memref<8x512xf32, #tpu.memory_space<vmem>>, vector<8x512xf32>
    %c0_90 = arith.constant 0 : index
    %c0_91 = arith.constant 0 : index
    %194 = vector.load %arg8[%c0_90, %c0_91] : memref<1x64xf32, #tpu.memory_space<vmem>>, vector<1x64xf32>
    %195 = vector.broadcast %194 : vector<1x64xf32> to vector<8x64xf32>
    %196 = arith.mulf %38, %195 : vector<8x64xf32>
    %197 = vector.extract_strided_slice %193 {offsets = [0, 0], sizes = [8, 64], strides = [1, 1]} : vector<8x512xf32> to vector<8x64xf32>
    %198 = vector.extract_strided_slice %54 {offsets = [0, 0], sizes = [8, 1], strides = [1, 1]} : vector<8x8xf32> to vector<8x1xf32>
    %199 = vector.broadcast %198 : vector<8x1xf32> to vector<8x64xf32>
    %200 = arith.mulf %197, %199 : vector<8x64xf32>
    %201 = arith.addf %196, %200 : vector<8x64xf32>
    %202 = vector.extract_strided_slice %193 {offsets = [0, 64], sizes = [8, 64], strides = [1, 1]} : vector<8x512xf32> to vector<8x64xf32>
    %203 = vector.extract_strided_slice %54 {offsets = [0, 1], sizes = [8, 1], strides = [1, 1]} : vector<8x8xf32> to vector<8x1xf32>
    %204 = vector.broadcast %203 : vector<8x1xf32> to vector<8x64xf32>
    %205 = arith.mulf %202, %204 : vector<8x64xf32>
    %206 = arith.addf %201, %205 : vector<8x64xf32>
    %207 = vector.extract_strided_slice %193 {offsets = [0, 128], sizes = [8, 64], strides = [1, 1]} : vector<8x512xf32> to vector<8x64xf32>
    %208 = vector.extract_strided_slice %54 {offsets = [0, 2], sizes = [8, 1], strides = [1, 1]} : vector<8x8xf32> to vector<8x1xf32>
    %209 = vector.broadcast %208 : vector<8x1xf32> to vector<8x64xf32>
    %210 = arith.mulf %207, %209 : vector<8x64xf32>
    %211 = arith.addf %206, %210 : vector<8x64xf32>
    %212 = vector.extract_strided_slice %193 {offsets = [0, 192], sizes = [8, 64], strides = [1, 1]} : vector<8x512xf32> to vector<8x64xf32>
    %213 = vector.extract_strided_slice %54 {offsets = [0, 3], sizes = [8, 1], strides = [1, 1]} : vector<8x8xf32> to vector<8x1xf32>
    %214 = vector.broadcast %213 : vector<8x1xf32> to vector<8x64xf32>
    %215 = arith.mulf %212, %214 : vector<8x64xf32>
    %216 = arith.addf %211, %215 : vector<8x64xf32>
    %217 = vector.extract_strided_slice %193 {offsets = [0, 256], sizes = [8, 64], strides = [1, 1]} : vector<8x512xf32> to vector<8x64xf32>
    %218 = vector.extract_strided_slice %54 {offsets = [0, 4], sizes = [8, 1], strides = [1, 1]} : vector<8x8xf32> to vector<8x1xf32>
    %219 = vector.broadcast %218 : vector<8x1xf32> to vector<8x64xf32>
    %220 = arith.mulf %217, %219 : vector<8x64xf32>
    %221 = arith.addf %216, %220 : vector<8x64xf32>
    %222 = vector.extract_strided_slice %193 {offsets = [0, 320], sizes = [8, 64], strides = [1, 1]} : vector<8x512xf32> to vector<8x64xf32>
    %223 = vector.extract_strided_slice %54 {offsets = [0, 5], sizes = [8, 1], strides = [1, 1]} : vector<8x8xf32> to vector<8x1xf32>
    %224 = vector.broadcast %223 : vector<8x1xf32> to vector<8x64xf32>
    %225 = arith.mulf %222, %224 : vector<8x64xf32>
    %226 = arith.addf %221, %225 : vector<8x64xf32>
    %227 = vector.extract_strided_slice %193 {offsets = [0, 384], sizes = [8, 64], strides = [1, 1]} : vector<8x512xf32> to vector<8x64xf32>
    %228 = vector.extract_strided_slice %54 {offsets = [0, 6], sizes = [8, 1], strides = [1, 1]} : vector<8x8xf32> to vector<8x1xf32>
    %229 = vector.broadcast %228 : vector<8x1xf32> to vector<8x64xf32>
    %230 = arith.mulf %227, %229 : vector<8x64xf32>
    %231 = arith.addf %226, %230 : vector<8x64xf32>
    %232 = vector.extract_strided_slice %193 {offsets = [0, 448], sizes = [8, 64], strides = [1, 1]} : vector<8x512xf32> to vector<8x64xf32>
    %233 = vector.extract_strided_slice %54 {offsets = [0, 7], sizes = [8, 1], strides = [1, 1]} : vector<8x8xf32> to vector<8x1xf32>
    %234 = vector.broadcast %233 : vector<8x1xf32> to vector<8x64xf32>
    %235 = arith.mulf %232, %234 : vector<8x64xf32>
    %236 = arith.addf %231, %235 : vector<8x64xf32>
    %cst_92 = arith.constant 0.000000e+00 : f32
    %237 = vector.broadcast %cst_92 : f32 to vector<8x64xf32>
    %238 = arith.subf %237, %5 : vector<8x64xf32>
    %239 = math.exp %238 : vector<8x64xf32>
    %cst_93 = arith.constant 1.000000e+00 : f32
    %240 = vector.broadcast %cst_93 : f32 to vector<8x64xf32>
    %241 = arith.addf %240, %239 : vector<8x64xf32>
    %cst_94 = arith.constant 1.000000e+00 : f32
    %242 = vector.broadcast %cst_94 : f32 to vector<8x64xf32>
    %243 = arith.divf %242, %241 : vector<8x64xf32>
    %244 = arith.mulf %5, %243 : vector<8x64xf32>
    %245 = arith.mulf %236, %244 : vector<8x64xf32>
    %c0_95 = arith.constant 0 : index
    %c0_96 = arith.constant 0 : index
    %246 = vector.load %arg9[%c0_95, %c0_96] : memref<64x128xf32, #tpu.memory_space<vmem>>, vector<64x128xf32>
    %cst_97 = arith.constant dense<0.000000e+00> : vector<8x128xf32>
    %247 = tpu.matmul %245, %246, %cst_97 {dimension_numbers = #tpu.dot_dimension_numbers<[1], [0], [0], [1], [0, 0, 1, 1], [], []>} : vector<8x64xf32>, vector<64x128xf32>, vector<8x128xf32> -> vector<8x128xf32>
    %248 = arith.addf %1, %247 : vector<8x128xf32>
    %c0_98 = arith.constant 0 : index
    %c0_99 = arith.constant 0 : index
    %249 = vector.load %arg14[%c0_98, %c0_99] : memref<1x128xf32, #tpu.memory_space<vmem>>, vector<1x128xf32>
    %c0_100 = arith.constant 0 : index
    %c0_101 = arith.constant 0 : index
    %250 = vector.load %arg15[%c0_100, %c0_101] : memref<1x128xf32, #tpu.memory_space<vmem>>, vector<1x128xf32>
    %cst_102 = arith.constant dense<0.000000e+00> : vector<8xf32>
    %251 = vector.multi_reduction <add>, %248, %cst_102 [1] : vector<8x128xf32> to vector<8xf32>
    %252 = vector.shape_cast %251 : vector<8xf32> to vector<8x1xf32>
    %cst_103 = arith.constant 3.125000e-02 : f32
    %253 = vector.broadcast %cst_103 : f32 to vector<8x1xf32>
    %254 = arith.mulf %252, %253 : vector<8x1xf32>
    %255 = vector.broadcast %254 : vector<8x1xf32> to vector<8x128xf32>
    %256 = arith.subf %248, %255 : vector<8x128xf32>
    %257 = tpu.iota {dimensions = array<i32: 1>} : vector<8x128xi32>
    %c32_i32 = arith.constant 32 : i32
    %258 = vector.broadcast %c32_i32 : i32 to vector<8x128xi32>
    %259 = arith.cmpi slt, %257, %258 : vector<8x128xi32>
    %cst_104 = arith.constant 0.000000e+00 : f32
    %260 = vector.broadcast %cst_104 : f32 to vector<8x128xf32>
    %261 = arith.select %259, %256, %260 : vector<8x128xi1>, vector<8x128xf32>
    %262 = arith.mulf %261, %261 : vector<8x128xf32>
    %cst_105 = arith.constant dense<0.000000e+00> : vector<8xf32>
    %263 = vector.multi_reduction <add>, %262, %cst_105 [1] : vector<8x128xf32> to vector<8xf32>
    %264 = vector.shape_cast %263 : vector<8xf32> to vector<8x1xf32>
    %cst_106 = arith.constant 3.125000e-02 : f32
    %265 = vector.broadcast %cst_106 : f32 to vector<8x1xf32>
    %266 = arith.mulf %264, %265 : vector<8x1xf32>
    %cst_107 = arith.constant 9.99999974E-6 : f32
    %267 = vector.broadcast %cst_107 : f32 to vector<8x1xf32>
    %268 = arith.addf %266, %267 : vector<8x1xf32>
    %269 = math.rsqrt %268 : vector<8x1xf32>
    %270 = vector.broadcast %269 : vector<8x1xf32> to vector<8x128xf32>
    %271 = arith.mulf %261, %270 : vector<8x128xf32>
    %272 = vector.broadcast %249 : vector<1x128xf32> to vector<8x128xf32>
    %273 = arith.mulf %271, %272 : vector<8x128xf32>
    %274 = vector.broadcast %250 : vector<1x128xf32> to vector<8x128xf32>
    %275 = arith.addf %273, %274 : vector<8x128xf32>
    %c0_108 = arith.constant 0 : index
    %c0_109 = arith.constant 0 : index
    %276 = vector.load %arg10[%c0_108, %c0_109] : memref<128x128xf32, #tpu.memory_space<vmem>>, vector<128x128xf32>
    %cst_110 = arith.constant dense<0.000000e+00> : vector<8x128xf32>
    %277 = tpu.matmul %275, %276, %cst_110 {dimension_numbers = #tpu.dot_dimension_numbers<[1], [0], [0], [1], [0, 0, 1, 1], [], []>} : vector<8x128xf32>, vector<128x128xf32>, vector<8x128xf32> -> vector<8x128xf32>
    %c0_111 = arith.constant 0 : index
    %c0_112 = arith.constant 0 : index
    %278 = vector.load %arg11[%c0_111, %c0_112] : memref<1x128xf32, #tpu.memory_space<vmem>>, vector<1x128xf32>
    %279 = vector.broadcast %278 : vector<1x128xf32> to vector<8x128xf32>
    %280 = arith.addf %277, %279 : vector<8x128xf32>
    %cst_113 = arith.constant 0.000000e+00 : f32
    %281 = vector.broadcast %cst_113 : f32 to vector<8x128xf32>
    %282 = arith.maximumf %280, %281 : vector<8x128xf32>
    %c0_114 = arith.constant 0 : index
    %c0_115 = arith.constant 0 : index
    %283 = vector.load %arg12[%c0_114, %c0_115] : memref<128x128xf32, #tpu.memory_space<vmem>>, vector<128x128xf32>
    %cst_116 = arith.constant dense<0.000000e+00> : vector<8x128xf32>
    %284 = tpu.matmul %282, %283, %cst_116 {dimension_numbers = #tpu.dot_dimension_numbers<[1], [0], [0], [1], [0, 0, 1, 1], [], []>} : vector<8x128xf32>, vector<128x128xf32>, vector<8x128xf32> -> vector<8x128xf32>
    %c0_117 = arith.constant 0 : index
    %c0_118 = arith.constant 0 : index
    %285 = vector.load %arg13[%c0_117, %c0_118] : memref<1x128xf32, #tpu.memory_space<vmem>>, vector<1x128xf32>
    %286 = vector.broadcast %285 : vector<1x128xf32> to vector<8x128xf32>
    %287 = arith.addf %284, %286 : vector<8x128xf32>
    %288 = arith.addf %275, %287 : vector<8x128xf32>
    %c0_119 = arith.constant 0 : index
    %c0_120 = arith.constant 0 : index
    %289 = vector.load %arg16[%c0_119, %c0_120] : memref<1x128xf32, #tpu.memory_space<vmem>>, vector<1x128xf32>
    %c0_121 = arith.constant 0 : index
    %c0_122 = arith.constant 0 : index
    %290 = vector.load %arg17[%c0_121, %c0_122] : memref<1x128xf32, #tpu.memory_space<vmem>>, vector<1x128xf32>
    %cst_123 = arith.constant dense<0.000000e+00> : vector<8xf32>
    %291 = vector.multi_reduction <add>, %288, %cst_123 [1] : vector<8x128xf32> to vector<8xf32>
    %292 = vector.shape_cast %291 : vector<8xf32> to vector<8x1xf32>
    %cst_124 = arith.constant 3.125000e-02 : f32
    %293 = vector.broadcast %cst_124 : f32 to vector<8x1xf32>
    %294 = arith.mulf %292, %293 : vector<8x1xf32>
    %295 = vector.broadcast %294 : vector<8x1xf32> to vector<8x128xf32>
    %296 = arith.subf %288, %295 : vector<8x128xf32>
    %297 = tpu.iota {dimensions = array<i32: 1>} : vector<8x128xi32>
    %c32_i32_125 = arith.constant 32 : i32
    %298 = vector.broadcast %c32_i32_125 : i32 to vector<8x128xi32>
    %299 = arith.cmpi slt, %297, %298 : vector<8x128xi32>
    %cst_126 = arith.constant 0.000000e+00 : f32
    %300 = vector.broadcast %cst_126 : f32 to vector<8x128xf32>
    %301 = arith.select %299, %296, %300 : vector<8x128xi1>, vector<8x128xf32>
    %302 = arith.mulf %301, %301 : vector<8x128xf32>
    %cst_127 = arith.constant dense<0.000000e+00> : vector<8xf32>
    %303 = vector.multi_reduction <add>, %302, %cst_127 [1] : vector<8x128xf32> to vector<8xf32>
    %304 = vector.shape_cast %303 : vector<8xf32> to vector<8x1xf32>
    %cst_128 = arith.constant 3.125000e-02 : f32
    %305 = vector.broadcast %cst_128 : f32 to vector<8x1xf32>
    %306 = arith.mulf %304, %305 : vector<8x1xf32>
    %cst_129 = arith.constant 9.99999974E-6 : f32
    %307 = vector.broadcast %cst_129 : f32 to vector<8x1xf32>
    %308 = arith.addf %306, %307 : vector<8x1xf32>
    %309 = math.rsqrt %308 : vector<8x1xf32>
    %310 = vector.broadcast %309 : vector<8x1xf32> to vector<8x128xf32>
    %311 = arith.mulf %301, %310 : vector<8x128xf32>
    %312 = vector.broadcast %289 : vector<1x128xf32> to vector<8x128xf32>
    %313 = arith.mulf %311, %312 : vector<8x128xf32>
    %314 = vector.broadcast %290 : vector<1x128xf32> to vector<8x128xf32>
    %315 = arith.addf %313, %314 : vector<8x128xf32>
    %c0_130 = arith.constant 0 : index
    %c0_131 = arith.constant 0 : index
    %c0_132 = arith.constant 0 : index
    %316 = vector.load %arg18[%c0_130, %c0_131, %c0_132] : memref<1x8x128xf32, #tpu.memory_space<vmem>>, vector<1x8x128xf32>
    %317 = vector.shape_cast %316 : vector<1x8x128xf32> to vector<8x128xf32>
    %318 = vector.shape_cast %315 : vector<8x128xf32> to vector<1x8x128xf32>
    tpu.vector_store %arg18[%c0_130, %c0_131, %c0_132], %318 {strides = array<i32>} : memref<1x8x128xf32, #tpu.memory_space<vmem>>, vector<1x8x128xf32>,
    return
  }
  func.func @transform_0(%arg0: i32) -> (i32, i32, i32) {
    %c0_i32 = arith.constant 0 : i32
    %c0_i32_0 = arith.constant 0 : i32
    %c0_i32_1 = arith.constant 0 : i32
    return %arg0, %c0_i32, %c0_i32_0 : i32, i32, i32
  }
  func.func @transform_1(%arg0: i32) -> (i32, i32) {
    %c0_i32 = arith.constant 0 : i32
    %c0_i32_0 = arith.constant 0 : i32
    %c0_i32_1 = arith.constant 0 : i32
    return %c0_i32, %c0_i32_0 : i32, i32
  }
  func.func @transform_2(%arg0: i32) -> (i32, i32) {
    %c0_i32 = arith.constant 0 : i32
    %c0_i32_0 = arith.constant 0 : i32
    %c0_i32_1 = arith.constant 0 : i32
    return %c0_i32, %c0_i32_0 : i32, i32
  }
  func.func @transform_3(%arg0: i32) -> (i32, i32) {
    %c0_i32 = arith.constant 0 : i32
    %c0_i32_0 = arith.constant 0 : i32
    %c0_i32_1 = arith.constant 0 : i32
    return %c0_i32, %c0_i32_0 : i32, i32
  }
  func.func @transform_4(%arg0: i32) -> (i32, i32) {
    %c0_i32 = arith.constant 0 : i32
    %c0_i32_0 = arith.constant 0 : i32
    %c0_i32_1 = arith.constant 0 : i32
    return %c0_i32, %c0_i32_0 : i32, i32
  }
  func.func @transform_5(%arg0: i32) -> (i32, i32) {
    %c0_i32 = arith.constant 0 : i32
    %c0_i32_0 = arith.constant 0 : i32
    %c0_i32_1 = arith.constant 0 : i32
    return %c0_i32, %c0_i32_0 : i32, i32
  }
  func.func @transform_6(%arg0: i32) -> (i32, i32) {
    %c0_i32 = arith.constant 0 : i32
    %c0_i32_0 = arith.constant 0 : i32
    %c0_i32_1 = arith.constant 0 : i32
    return %c0_i32, %c0_i32_0 : i32, i32
  }
  func.func @transform_7(%arg0: i32) -> (i32, i32) {
    %c0_i32 = arith.constant 0 : i32
    %c0_i32_0 = arith.constant 0 : i32
    %c0_i32_1 = arith.constant 0 : i32
    return %c0_i32, %c0_i32_0 : i32, i32
  }
  func.func @transform_8(%arg0: i32) -> (i32, i32) {
    %c0_i32 = arith.constant 0 : i32
    %c0_i32_0 = arith.constant 0 : i32
    %c0_i32_1 = arith.constant 0 : i32
    return %c0_i32, %c0_i32_0 : i32, i32
  }
  func.func @transform_9(%arg0: i32) -> (i32, i32) {
    %c0_i32 = arith.constant 0 : i32
    %c0_i32_0 = arith.constant 0 : i32
    %c0_i32_1 = arith.constant 0 : i32
    return %c0_i32, %c0_i32_0 : i32, i32
  }
  func.func @transform_10(%arg0: i32) -> (i32, i32) {
    %c0_i32 = arith.constant 0 : i32
    %c0_i32_0 = arith.constant 0 : i32
    %c0_i32_1 = arith.constant 0 : i32
    return %c0_i32, %c0_i32_0 : i32, i32
  }
  func.func @transform_11(%arg0: i32) -> (i32, i32) {
    %c0_i32 = arith.constant 0 : i32
    %c0_i32_0 = arith.constant 0 : i32
    %c0_i32_1 = arith.constant 0 : i32
    return %c0_i32, %c0_i32_0 : i32, i32
  }
  func.func @transform_12(%arg0: i32) -> (i32, i32) {
    %c0_i32 = arith.constant 0 : i32
    %c0_i32_0 = arith.constant 0 : i32
    %c0_i32_1 = arith.constant 0 : i32
    return %c0_i32, %c0_i32_0 : i32, i32
  }
  func.func @transform_13(%arg0: i32) -> (i32, i32) {
    %c0_i32 = arith.constant 0 : i32
    %c0_i32_0 = arith.constant 0 : i32
    %c0_i32_1 = arith.constant 0 : i32
    return %c0_i32, %c0_i32_0 : i32, i32
  }
  func.func @transform_14(%arg0: i32) -> (i32, i32) {
    %c0_i32 = arith.constant 0 : i32
    %c0_i32_0 = arith.constant 0 : i32
    %c0_i32_1 = arith.constant 0 : i32
    return %c0_i32, %c0_i32_0 : i32, i32
  }
  func.func @transform_15(%arg0: i32) -> (i32, i32) {
    %c0_i32 = arith.constant 0 : i32
    %c0_i32_0 = arith.constant 0 : i32
    %c0_i32_1 = arith.constant 0 : i32
    return %c0_i32, %c0_i32_0 : i32, i32
  }
  func.func @transform_16(%arg0: i32) -> (i32, i32) {
    %c0_i32 = arith.constant 0 : i32
    %c0_i32_0 = arith.constant 0 : i32
    %c0_i32_1 = arith.constant 0 : i32
    return %c0_i32, %c0_i32_0 : i32, i32
  }
  func.func @transform_17(%arg0: i32) -> (i32, i32, i32) {
    %c0_i32 = arith.constant 0 : i32
    %c0_i32_0 = arith.constant 0 : i32
    %c0_i32_1 = arith.constant 0 : i32
    return %arg0, %c0_i32, %c0_i32_0 : i32, i32, i32
  }
}

</mosaic_0001>

<bundles_post_ra>
// kernel: tpu_custom_call.1
= control target key start
LH: loop header
LB: loop body
LE: loop exit
PB: predicated region body
PF: predicated region fallthrough
CT: control target
= control target key end

     0   :  { %s3931_s0 = inlined_call_operand.hbm [shape: f32[2,8,128], index: 0, kind: input, shape index: {}]   ;;  %s3932_s1 = inlined_call_operand.hbm [shape: f32[128,128], index: 1, kind: input, shape index: {}]   ;;  %s3933_s2 = inlined_call_operand.hbm [shape: f32[4,64], index: 2, kind: input, shape index: {}]   ;;  %s3934_s3 = inlined_call_operand.hbm [shape: f32[1,64], index: 3, kind: input, shape index: {}]   ;;  %s3935_s4 = inlined_call_operand.hbm [shape: f32[64,80], index: 4, kind: input, shape index: {}]   ;;  %s3936_s5 = inlined_call_operand.hbm [shape: f32[1,64], index: 5, kind: input, shape index: {}]   ;;  %s3937_s6 = inlined_call_operand.hbm [shape: f32[8,64], index: 6, kind: input, shape index: {}]   ;;  %s3938_s7 = inlined_call_operand.hbm [shape: f32[1,64], index: 7, kind: input, shape index: {}]   ;;  %s3939_s8 = inlined_call_operand.hbm [shape: f32[64,128], index: 8, kind: input, shape index: {}]   ;;  %s3940_s9 = inlined_call_operand.hbm [shape: f32[128,128], index: 9, kind: input, shape index: {}]   ;;  %s3941_s10 = inlined_call_operand.hbm [shape: f32[1,128], index: 10, kind: input, shape index: {}]   ;;  %s3942_s11 = inlined_call_operand.hbm [shape: f32[128,128], index: 11, kind: input, shape index: {}]   ;;  %s3943_s12 = inlined_call_operand.hbm [shape: f32[1,128], index: 12, kind: input, shape index: {}]   ;;  %s3944_s13 = inlined_call_operand.hbm [shape: f32[1,128], index: 13, kind: input, shape index: {}]   ;;  %s3945_s14 = inlined_call_operand.hbm [shape: f32[1,128], index: 14, kind: input, shape index: {}]   ;;  %s3946_s15 = inlined_call_operand.hbm [shape: f32[1,128], index: 15, kind: input, shape index: {}]   ;;  %s3947_s16 = inlined_call_operand.hbm [shape: f32[1,128], index: 16, kind: input, shape index: {}]   ;;  %s3948_s17 = inlined_call_operand.hbm [shape: f32[2,8,128], index: 17, kind: output, shape index: {}]  }
   0x1   :  { %3967 = sst [smem:[#allocation49_spill]] %s3931_s0 }
   0x2   :  { %3968 = sst [smem:[#allocation50_spill]] %s3932_s1 }
   0x3   :  { %3969 = sst [smem:[#allocation51_spill]] %s3933_s2 }
   0x4   :  { %3970 = sst [smem:[#allocation52_spill]] %s3934_s3 }
   0x5   :  { %3971 = sst [smem:[#allocation53_spill]] %s3947_s16 }
   0x6   :  { %3972 = sst [smem:[#allocation54_spill]] %s3948_s17 }
   0x7   :  { %22 = vsyncpa [#allocation6], 0 }
   0x8   :  { %24 = vsyncpa [#allocation6 + $0x1], 0 }
   0x9   :  { %25 = vsyncpa [#allocation9], 0 }
   0xa   :  { %26 = vsyncpa [#allocation12], 0 }
   0xb   :  { %27 = vsyncpa [#allocation15], 0 }
   0xc   :  { %28 = vsyncpa [#allocation18], 0 }
   0xd   :  { %29 = vsyncpa [#allocation21], 0 }
   0xe   :  { %30 = vsyncpa [#allocation24], 0 }
   0xf   :  { %31 = vsyncpa [#allocation27], 0 }
  0x10   :  { %32 = vsyncpa [#allocation30], 0 }
  0x11   :  { %33 = vsyncpa [#allocation7], 0 }
  0x12   :  { %35 = vsyncpa [#allocation7 + $0x1], 0  ;;  %s3243_s24 = smov 0   ;;  %s3245_s25 = smov 0  }
  0x13   :  { %s3247_s26 = smov 0   ;;  %s3249_s27 = smov 0  }
  0x14 LB: > { %3973 = sst [smem:[#allocation43_spill]] %s3099_s24  ;;  %s3113_s28 = smov [#allocation8]   ;;  %s3111_s27 = sphi %s3249_s27, %s4030_s27   ;;  %s3107_s26 = sphi %s3247_s26, %s4029_s26   ;;  %s3103_s25 = sphi %s3245_s25, %s4028_s25   ;;  %s3099_s24 = sphi %s3243_s24, %s4027_s24  }
  0x15   : > { %3974 = sst [smem:[#allocation44_spill]] %s3103_s25  ;;  %s446_s29 = sshll.u32 %s3113_s28, 4  ;;  %s3269_s29 = int_to_ptr.vmem [resolvable:$true] %s446_s29 }
  0x16   : > { %3975 = sst [smem:[#allocation45_spill]] %s3107_s26  ;;  %s3264_s0 = sadd.s32 4294967295, %s3111_s27  }
  0x17   : > { %3976 = sst [smem:[#allocation46_spill]] %s3111_s27  ;;  %p1887_p0 = scmp.ge.s32.totalorder %s3111_s27, 1 }
  0x18   : > { %3977 = sst [smem:[#allocation47_spill]] %s3264_s0  ;;  %p3963_p1 = scmp.eq.s32.totalorder %s3264_s0, 0 }
  0x19   : > { %p434_p2 = scmp.lt.s32.totalorder %s3111_s27, 3  ;;  %s3114_s18 = smov [#allocation11]  }
  0x1a   : > { %s471_s19 = sshll.u32 %s3114_s18, 4  ;;  %s3115_s20 = smov [#allocation14]   ;;  %s3284_s19 = int_to_ptr.vmem [resolvable:$true] %s471_s19 }
  0x1b   : > { %p3271_p3 = pnand %p1887_p0, %p434_p2  ;;  %s495_s21 = sshll.u32 %s3115_s20, 4  ;;  %s3286_s21 = int_to_ptr.vmem [resolvable:$true] %s495_s21 }
  0x1c   : > { %s3981_s28 = sld [smem:[#allocation50_spill]] }
  0x1d   : > { %s3978_s30 = scalar_select %p3271_p3, 1, 0 }
  0x1e   : > { %p2325_p5 = pneg %p3271_p3 }
  0x1f   : > { %3979 = sst [smem:[#allocation48_spill]] %s3978_s30 }
  0x20   : > { %p3280_p6 = pnand %p2325_p5, %p3963_p1 }
  0x22   : > { %s2535_s17 = scalar_lea.hbm %s3981_s28, 2048  ;;  %p3296_p8 = pneg %p3280_p6 }
  0x23   : > { %p2536_p7 = scmp.ne.s32.totalorder %s3981_s28, %s2535_s17  ;;  %p2542_p11 = scmp.lt.u32.totalorder %s2535_s17, %s3981_s28 }
  0x25   : > { %p2538_p9 = pnand %p3296_p8, %p2536_p7 }
  0x27   : > { %p2539_p10 = pneg %p2538_p9 }
  0x29   : > { %p2544_p12 = pnand %p2542_p11, %p2539_p10 }
  0x2b   : > { %2547 = shalt.err (!%p2544_p12)
}
  0x2c   : > { %s2548_s24 = scalar_lea.vmem %s3269_s29, 2048  ;;  %p2556_p5 = scmp.lt.s32.totalorder %s3269_s29, %s3269_s29 }
  0x2d   : > { %p2549_p13 = scmp.ne.s32.totalorder %s3269_s29, %s2548_s24  ;;  %p2557_p4 = scmp.lt.s32.totalorder %s2548_s24, %s2548_s24 }
  0x2f   : > { %p2551_p0 = pnand %p2549_p13, %p3296_p8  ;;  %p2558_p7 = por %p2557_p4, %p2556_p5 }
  0x31   : > { %p2552_p2 = pneg %p2551_p0 }
  0x33   : > { %p2559_p9 = pnand %p2558_p7, %p2552_p2 }
  0x35   : > { %2562 = shalt.err (!%p2559_p9)
}
  0x36   : > { %s3961_s30 = smov 128   ;;  %s3117_s17 = smov 8  }
  0x37   : > { %2328 = dma.hbm_to_vmem [thread:$0]  (!%p3280_p6), %s3981_s28, 2048, %s3269_s29, [#allocation9], %s3961_s30, %s3961_s30, %s3117_s17  }
  0x38   : > { %s3983_s3 = sld [smem:[#allocation52_spill]] }
  0x3e   : > { %s2563_s24 = scalar_lea.hbm %s3983_s3, 16 }
  0x3f   : > { %p2564_p4 = scmp.ne.s32.totalorder %s3983_s3, %s2563_s24  ;;  %p2570_p12 = scmp.lt.u32.totalorder %s2563_s24, %s3983_s3 }
  0x41   : > { %p2566_p10 = pnand %p2564_p4, %p3296_p8 }
  0x43   : > { %p2567_p11 = pneg %p2566_p10 }
  0x45   : > { %p2572_p13 = pnand %p2570_p12, %p2567_p11 }
  0x47   : > { %2575 = shalt.err (!%p2572_p13)
}
  0x48   : > { %s2576_s29 = scalar_lea.vmem %s3284_s19, 16  ;;  %s2583_s25 = scalar_lea.vmem %s3284_s19, 32 }
  0x49   : > { %p2577_p0 = scmp.ne.s32.totalorder %s3284_s19, %s2576_s29  ;;  %p2584_p7 = scmp.lt.s32.totalorder %s3284_s19, %s3284_s19 }
  0x4a   : > { %p2585_p9 = scmp.lt.s32.totalorder %s2583_s25, %s2576_s29 }
  0x4b   : > { %p2579_p2 = pnand %p2577_p0, %p3296_p8 }
  0x4c   : > { %p2586_p4 = por %p2585_p9, %p2584_p7 }
  0x4d   : > { %p2580_p5 = pneg %p2579_p2 }
  0x4f   : > { %p2587_p10 = pnand %p2586_p4, %p2580_p5 }
  0x51   : > { %2590 = shalt.err (!%p2587_p10)
}
  0x52   : > { %2334 = dma.hbm_to_vmem [thread:$0]  (!%p3280_p6), %s3983_s3, 16, %s3284_s19, [#allocation12]  }
  0x53   : > { %s2591_s22 = scalar_lea.hbm %s3936_s5, 16 }
  0x54   : > { %p2592_p11 = scmp.ne.s32.totalorder %s3936_s5, %s2591_s22  ;;  %p2598_p0 = scmp.lt.u32.totalorder %s2591_s22, %s3936_s5 }
  0x56   : > { %p2594_p12 = pnand %p2592_p11, %p3296_p8 }
  0x58   : > { %p2595_p13 = pneg %p2594_p12 }
  0x5a   : > { %p2600_p2 = pnand %p2598_p0, %p2595_p13 }
  0x5c   : > { %2603 = shalt.err (!%p2600_p2)
}
  0x5d   : > { %s2604_s19 = scalar_lea.vmem %s3286_s21, 16  ;;  %s2611_s25 = scalar_lea.vmem %s3286_s21, 32 }
  0x5e   : > { %p2605_p5 = scmp.ne.s32.totalorder %s3286_s21, %s2604_s19  ;;  %p2612_p4 = scmp.lt.s32.totalorder %s3286_s21, %s3286_s21 }
  0x5f   : > { %p2613_p10 = scmp.lt.s32.totalorder %s2611_s25, %s2604_s19 }
  0x60   : > { %p2607_p7 = pnand %p2605_p5, %p3296_p8 }
  0x61   : > { %p2614_p11 = por %p2613_p10, %p2612_p4 }
  0x62   : > { %p2608_p9 = pneg %p2607_p7 }
  0x64   : > { %p2615_p12 = pnand %p2614_p11, %p2608_p9 }
  0x66   : > { %2618 = shalt.err (!%p2615_p12)
}
  0x67   : > { %2340 = dma.hbm_to_vmem [thread:$0]  (!%p3280_p6), %s3936_s5, 16, %s3286_s21, [#allocation15]  }
  0x68   : > { %s3118_s27 = smov [#allocation17]   ;;  %s3119_s22 = smov [#allocation20]  }
  0x69   : > { %s517_s0 = sshll.u32 %s3118_s27, 4  ;;  %s540_s23 = sshll.u32 %s3119_s22, 4  ;;  %s518_s0 = int_to_ptr.vmem [resolvable:$true] %s517_s0  ;;  %s541_s23 = int_to_ptr.vmem [resolvable:$true] %s540_s23 }
  0x6a   : > { %s2619_s29 = scalar_lea.hbm %s3938_s7, 16 }
  0x6b   : > { %p2620_p13 = scmp.ne.s32.totalorder %s3938_s7, %s2619_s29  ;;  %p2626_p5 = scmp.lt.u32.totalorder %s2619_s29, %s3938_s7 }
  0x6d   : > { %p2622_p0 = pnand %p2620_p13, %p3296_p8 }
  0x6f   : > { %p2623_p2 = pneg %p2622_p0 }
  0x71   : > { %p2628_p7 = pnand %p2626_p5, %p2623_p2 }
  0x73   : > { %2631 = shalt.err (!%p2628_p7)
}
  0x74   : > { %s2632_s21 = scalar_lea.vmem %s518_s0, 16  ;;  %s2639_s26 = scalar_lea.vmem %s518_s0, 32 }
  0x75   : > { %p2633_p9 = scmp.ne.s32.totalorder %s518_s0, %s2632_s21  ;;  %p2640_p11 = scmp.lt.s32.totalorder %s518_s0, %s518_s0 }
  0x76   : > { %p2641_p12 = scmp.lt.s32.totalorder %s2639_s26, %s2632_s21 }
  0x77   : > { %p2635_p4 = pnand %p2633_p9, %p3296_p8 }
  0x78   : > { %p2642_p1 = por %p2641_p12, %p2640_p11 }
  0x79   : > { %p2636_p10 = pneg %p2635_p4 }
  0x7b   : > { %p2643_p3 = pnand %p2642_p1, %p2636_p10 }
  0x7d   : > { %2646 = shalt.err (!%p2643_p3)
}
  0x7e   : > { %2346 = dma.hbm_to_vmem [thread:$0]  (!%p3280_p6), %s3938_s7, 16, %s518_s0, [#allocation18]  }
  0x7f   : > { %s2647_s24 = scalar_lea.hbm %s3940_s9, 2048 }
  0x80   : > { %p2648_p13 = scmp.ne.s32.totalorder %s3940_s9, %s2647_s24  ;;  %p2654_p3 = scmp.lt.u32.totalorder %s2647_s24, %s3940_s9 }
  0x82   : > { %p2650_p0 = pnand %p2648_p13, %p3296_p8 }
  0x84   : > { %p2651_p1 = pneg %p2650_p0 }
  0x86   : > { %p2656_p2 = pnand %p2654_p3, %p2651_p1 }
  0x88   : > { %2659 = shalt.err (!%p2656_p2)
}
  0x89   : > { %s2660_s21 = scalar_lea.vmem %s541_s23, 2048  ;;  %p2668_p4 = scmp.lt.s32.totalorder %s541_s23, %s541_s23 }
  0x8a   : > { %p2661_p5 = scmp.ne.s32.totalorder %s541_s23, %s2660_s21  ;;  %p2669_p10 = scmp.lt.s32.totalorder %s2660_s21, %s2660_s21 }
  0x8c   : > { %p2663_p7 = pnand %p2661_p5, %p3296_p8  ;;  %p2670_p11 = por %p2669_p10, %p2668_p4 }
  0x8e   : > { %p2664_p9 = pneg %p2663_p7 }
  0x90   : > { %p2671_p12 = pnand %p2670_p11, %p2664_p9 }
  0x92   : > { %2674 = shalt.err (!%p2671_p12)
}
  0x93   : > { %s3984_s0 = smov 128   ;;  %s3120_s22 = smov [#allocation23]  }
  0x94   : > { %2352 = dma.hbm_to_vmem [thread:$0]  (!%p3280_p6), %s3940_s9, 2048, %s541_s23, [#allocation21], %s3984_s0, %s3984_s0, %s3117_s17  }
  0x95   : > { %s564_s30 = sshll.u32 %s3120_s22, 4  ;;  %s3121_s20 = smov [#allocation26]   ;;  %s565_s30 = int_to_ptr.vmem [resolvable:$true] %s564_s30 }
  0x96   : > { %s589_s24 = sshll.u32 %s3121_s20, 4  ;;  %s2675_s25 = scalar_lea.hbm %s3942_s11, 2048  ;;  %s590_s24 = int_to_ptr.vmem [resolvable:$true] %s589_s24 }
  0x97   : > { %p2676_p13 = scmp.ne.s32.totalorder %s3942_s11, %s2675_s25  ;;  %p2682_p3 = scmp.lt.u32.totalorder %s2675_s25, %s3942_s11 }
  0x99   : > { %p2678_p0 = pnand %p2676_p13, %p3296_p8 }
  0x9b   : > { %p2679_p1 = pneg %p2678_p0 }
  0x9d   : > { %p2684_p2 = pnand %p2682_p3, %p2679_p1 }
  0x9f   : > { %2687 = shalt.err (!%p2684_p2)
}
  0xa0   : > { %s2688_s23 = scalar_lea.vmem %s565_s30, 2048  ;;  %p2696_p4 = scmp.lt.s32.totalorder %s565_s30, %s565_s30 }
  0xa1   : > { %p2689_p5 = scmp.ne.s32.totalorder %s565_s30, %s2688_s23  ;;  %p2697_p10 = scmp.lt.s32.totalorder %s2688_s23, %s2688_s23 }
  0xa3   : > { %p2691_p7 = pnand %p2689_p5, %p3296_p8  ;;  %p2698_p11 = por %p2697_p10, %p2696_p4 }
  0xa5   : > { %p2692_p9 = pneg %p2691_p7 }
  0xa7   : > { %p2699_p12 = pnand %p2698_p11, %p2692_p9 }
  0xa9   : > { %2702 = shalt.err (!%p2699_p12)
}
  0xaa   : > { %2358 = dma.hbm_to_vmem [thread:$0]  (!%p3280_p6), %s3942_s11, 2048, %s565_s30, [#allocation24], %s3984_s0, %s3984_s0, %s3117_s17  }
  0xab   : > { %s2703_s29 = scalar_lea.hbm %s3944_s13, 16 }
  0xac   : > { %p2704_p13 = scmp.ne.s32.totalorder %s3944_s13, %s2703_s29  ;;  %p2710_p3 = scmp.lt.u32.totalorder %s2703_s29, %s3944_s13 }
  0xae   : > { %p2706_p0 = pnand %p2704_p13, %p3296_p8 }
  0xb0   : > { %p2707_p1 = pneg %p2706_p0 }
  0xb2   : > { %p2712_p2 = pnand %p2710_p3, %p2707_p1 }
  0xb4   : > { %2715 = shalt.err (!%p2712_p2)
}
  0xb5   : > { %s2716_s26 = scalar_lea.vmem %s590_s24, 16  ;;  %s2723_s30 = scalar_lea.vmem %s590_s24, 32 }
  0xb6   : > { %p2717_p5 = scmp.ne.s32.totalorder %s590_s24, %s2716_s26  ;;  %p2724_p4 = scmp.lt.s32.totalorder %s590_s24, %s590_s24 }
  0xb7   : > { %p2725_p10 = scmp.lt.s32.totalorder %s2723_s30, %s2716_s26 }
  0xb8   : > { %p2719_p7 = pnand %p2717_p5, %p3296_p8 }
  0xb9   : > { %p2726_p11 = por %p2725_p10, %p2724_p4 }
  0xba   : > { %p2720_p9 = pneg %p2719_p7 }
  0xbc   : > { %p2727_p12 = pnand %p2726_p11, %p2720_p9 }
  0xbe   : > { %2730 = shalt.err (!%p2727_p12)
}
  0xbf   : > { %2364 = dma.hbm_to_vmem [thread:$0]  (!%p3280_p6), %s3944_s13, 16, %s590_s24, [#allocation27]  }
  0xc0   : > { %s3122_s27 = smov [#allocation29]   ;;  %s3123_s20 = smov [#allocation10]  }
  0xc1   : > { %s611_s22 = sshll.u32 %s3122_s27, 4  ;;  %s460_s29 = sshll.u32 %s3123_s20, 4  ;;  %s612_s22 = int_to_ptr.vmem [resolvable:$true] %s611_s22  ;;  %s461_s29 = int_to_ptr.vmem [resolvable:$true] %s460_s29 }
  0xc2   : > { %s2731_s16 = scalar_lea.hbm %s3946_s15, 16 }
  0xc3   : > { %p2732_p13 = scmp.ne.s32.totalorder %s3946_s15, %s2731_s16  ;;  %p2738_p3 = scmp.lt.u32.totalorder %s2731_s16, %s3946_s15 }
  0xc5   : > { %p2734_p0 = pnand %p2732_p13, %p3296_p8 }
  0xc7   : > { %p2735_p1 = pneg %p2734_p0 }
  0xc9   : > { %p2740_p2 = pnand %p2738_p3, %p2735_p1 }
  0xcb   : > { %2743 = shalt.err (!%p2740_p2)
}
  0xcc   : > { %s2744_s24 = scalar_lea.vmem %s612_s22, 16  ;;  %s2751_s3 = scalar_lea.vmem %s612_s22, 32 }
  0xcd   : > { %p2745_p5 = scmp.ne.s32.totalorder %s612_s22, %s2744_s24  ;;  %p2752_p4 = scmp.lt.s32.totalorder %s612_s22, %s612_s22 }
  0xce   : > { %p2753_p10 = scmp.lt.s32.totalorder %s2751_s3, %s2744_s24 }
  0xcf   : > { %p2747_p7 = pnand %p2745_p5, %p3296_p8 }
  0xd0   : > { %p2754_p11 = por %p2753_p10, %p2752_p4 }
  0xd1   : > { %p2748_p9 = pneg %p2747_p7 }
  0xd3   : > { %p2755_p12 = pnand %p2754_p11, %p2748_p9 }
  0xd5   : > { %2758 = shalt.err (!%p2755_p12)
}
  0xd6   : > { %2370 = dma.hbm_to_vmem [thread:$0]  (!%p3280_p6), %s3946_s15, 16, %s612_s22, [#allocation30]  }
  0xd7   : > { %s3985_s2 = sld [smem:[#allocation51_spill]] }
  0xdd   : > { %s2759_s16 = scalar_lea.hbm %s3985_s2, 64 }
  0xde   : > { %p2760_p13 = scmp.ne.s32.totalorder %s3985_s2, %s2759_s16  ;;  %p2766_p3 = scmp.lt.u32.totalorder %s2759_s16, %s3985_s2 }
  0xe0   : > { %p2762_p0 = pnand %p2760_p13, %p3296_p8 }
  0xe2   : > { %p2763_p1 = pneg %p2762_p0 }
  0xe4   : > { %p2768_p2 = pnand %p2766_p3, %p2763_p1 }
  0xe6   : > { %2771 = shalt.err (!%p2768_p2)
}
  0xe7   : > { %s2772_s24 = scalar_lea.vmem %s461_s29, 64  ;;  %p2780_p4 = scmp.lt.s32.totalorder %s461_s29, %s461_s29 }
  0xe8   : > { %p2773_p5 = scmp.ne.s32.totalorder %s461_s29, %s2772_s24  ;;  %p2781_p10 = scmp.lt.s32.totalorder %s2772_s24, %s2772_s24 }
  0xea   : > { %p2775_p7 = pnand %p2773_p5, %p3296_p8  ;;  %p2782_p11 = por %p2781_p10, %p2780_p4 }
  0xec   : > { %p2776_p9 = pneg %p2775_p7 }
  0xee   : > { %p2783_p12 = pnand %p2782_p11, %p2776_p9 }
  0xf0   : > { %2786 = shalt.err (!%p2783_p12)
}
  0xf1   : > { %2331 = dma.hbm_to_vmem [thread:$0]  (!%p3280_p6), %s3985_s2, 64, %s461_s29, [#allocation9]  }
  0xf2   : > { %s3124_s27 = smov [#allocation13]   ;;  %s3125_s19 = smov [#allocation16]  }
  0xf3   : > { %s481_s20 = sshll.u32 %s3124_s27, 4  ;;  %s506_s25 = sshll.u32 %s3125_s19, 4  ;;  %s482_s20 = int_to_ptr.vmem [resolvable:$true] %s481_s20  ;;  %s507_s25 = int_to_ptr.vmem [resolvable:$true] %s506_s25 }
  0xf4   : > { %s2787_s26 = scalar_lea.hbm %s3935_s4, 1024 }
  0xf5   : > { %p2788_p13 = scmp.ne.s32.totalorder %s3935_s4, %s2787_s26  ;;  %p2794_p3 = scmp.lt.u32.totalorder %s2787_s26, %s3935_s4 }
  0xf7   : > { %p2790_p0 = pnand %p2788_p13, %p3296_p8 }
  0xf9   : > { %p2791_p1 = pneg %p2790_p0 }
  0xfb   : > { %p2796_p2 = pnand %p2794_p3, %p2791_p1 }
  0xfd   : > { %2799 = shalt.err (!%p2796_p2)
}
  0xfe   : > { %s2800_s29 = scalar_lea.vmem %s482_s20, 1024  ;;  %p2808_p4 = scmp.lt.s32.totalorder %s482_s20, %s482_s20 }
  0xff   : > { %p2801_p5 = scmp.ne.s32.totalorder %s482_s20, %s2800_s29  ;;  %p2809_p10 = scmp.lt.s32.totalorder %s2800_s29, %s2800_s29 }
 0x101   : > { %p2803_p7 = pnand %p2801_p5, %p3296_p8  ;;  %p2810_p11 = por %p2809_p10, %p2808_p4 }
 0x103   : > { %p2804_p9 = pneg %p2803_p7 }
 0x105   : > { %p2811_p12 = pnand %p2810_p11, %p2804_p9 }
 0x107   : > { %2814 = shalt.err (!%p2811_p12)
}
 0x108   : > { %2337 = dma.hbm_to_vmem [thread:$0]  (!%p3280_p6), %s3935_s4, 1024, %s482_s20, [#allocation12], %s3984_s0, %s3984_s0, %s3117_s17  }
 0x109   : > { %s2815_s21 = scalar_lea.hbm %s3937_s6, 128 }
 0x10a   : > { %p2816_p13 = scmp.ne.s32.totalorder %s3937_s6, %s2815_s21  ;;  %p2822_p3 = scmp.lt.u32.totalorder %s2815_s21, %s3937_s6 }
 0x10c   : > { %p2818_p0 = pnand %p2816_p13, %p3296_p8 }
 0x10e   : > { %p2819_p1 = pneg %p2818_p0 }
 0x110   : > { %p2824_p2 = pnand %p2822_p3, %p2819_p1 }
 0x112   : > { %2827 = shalt.err (!%p2824_p2)
}
 0x113   : > { %s2828_s22 = scalar_lea.vmem %s507_s25, 128  ;;  %p2836_p4 = scmp.lt.s32.totalorder %s507_s25, %s507_s25 }
 0x114   : > { %p2829_p5 = scmp.ne.s32.totalorder %s507_s25, %s2828_s22  ;;  %p2837_p10 = scmp.lt.s32.totalorder %s2828_s22, %s2828_s22 }
 0x116   : > { %p2831_p7 = pnand %p2829_p5, %p3296_p8  ;;  %p2838_p11 = por %p2837_p10, %p2836_p4 }
 0x118   : > { %p2832_p9 = pneg %p2831_p7 }
 0x11a   : > { %p2839_p12 = pnand %p2838_p11, %p2832_p9 }
 0x11c   : > { %2842 = shalt.err (!%p2839_p12)
}
 0x11d   : > { %2343 = dma.hbm_to_vmem [thread:$0]  (!%p3280_p6), %s3937_s6, 128, %s507_s25, [#allocation15]  }
 0x11e   : > { %s3126_s3 = smov [#allocation19]   ;;  %s3127_s19 = smov [#allocation22]  }
 0x11f   : > { %s527_s27 = sshll.u32 %s3126_s3, 4  ;;  %s554_s16 = sshll.u32 %s3127_s19, 4  ;;  %s528_s27 = int_to_ptr.vmem [resolvable:$true] %s527_s27  ;;  %s555_s16 = int_to_ptr.vmem [resolvable:$true] %s554_s16 }
 0x120   : > { %s2843_s30 = scalar_lea.hbm %s3939_s8, 1024 }
 0x121   : > { %p2844_p13 = scmp.ne.s32.totalorder %s3939_s8, %s2843_s30  ;;  %p2850_p3 = scmp.lt.u32.totalorder %s2843_s30, %s3939_s8 }
 0x123   : > { %p2846_p0 = pnand %p2844_p13, %p3296_p8 }
 0x125   : > { %p2847_p1 = pneg %p2846_p0 }
 0x127   : > { %p2852_p2 = pnand %p2850_p3, %p2847_p1 }
 0x129   : > { %2855 = shalt.err (!%p2852_p2)
}
 0x12a   : > { %s2856_s25 = scalar_lea.vmem %s528_s27, 1024  ;;  %p2864_p4 = scmp.lt.s32.totalorder %s528_s27, %s528_s27 }
 0x12b   : > { %p2857_p5 = scmp.ne.s32.totalorder %s528_s27, %s2856_s25  ;;  %p2865_p10 = scmp.lt.s32.totalorder %s2856_s25, %s2856_s25 }
 0x12d   : > { %p2859_p7 = pnand %p2857_p5, %p3296_p8  ;;  %p2866_p11 = por %p2865_p10, %p2864_p4 }
 0x12f   : > { %p2860_p9 = pneg %p2859_p7 }
 0x131   : > { %p2867_p12 = pnand %p2866_p11, %p2860_p9 }
 0x133   : > { %2870 = shalt.err (!%p2867_p12)
}
 0x134   : > { %2349 = dma.hbm_to_vmem [thread:$0]  (!%p3280_p6), %s3939_s8, 1024, %s528_s27, [#allocation18], %s3984_s0, %s3984_s0, %s3117_s17  }
 0x135   : > { %s2871_s26 = scalar_lea.hbm %s3941_s10, 16 }
 0x136   : > { %p2872_p13 = scmp.ne.s32.totalorder %s3941_s10, %s2871_s26  ;;  %p2878_p3 = scmp.lt.u32.totalorder %s2871_s26, %s3941_s10 }
 0x138   : > { %p2874_p0 = pnand %p2872_p13, %p3296_p8 }
 0x13a   : > { %p2875_p1 = pneg %p2874_p0 }
 0x13c   : > { %p2880_p2 = pnand %p2878_p3, %p2875_p1 }
 0x13e   : > { %2883 = shalt.err (!%p2880_p2)
}
 0x13f   : > { %s2884_s20 = scalar_lea.vmem %s555_s16, 16  ;;  %s2891_s17 = scalar_lea.vmem %s555_s16, 32 }
 0x140   : > { %p2885_p5 = scmp.ne.s32.totalorder %s555_s16, %s2884_s20  ;;  %p2892_p4 = scmp.lt.s32.totalorder %s555_s16, %s555_s16 }
 0x141   : > { %p2893_p10 = scmp.lt.s32.totalorder %s2891_s17, %s2884_s20 }
 0x142   : > { %p2887_p7 = pnand %p2885_p5, %p3296_p8 }
 0x143   : > { %p2894_p11 = por %p2893_p10, %p2892_p4 }
 0x144   : > { %p2888_p9 = pneg %p2887_p7 }
 0x146   : > { %p2895_p12 = pnand %p2894_p11, %p2888_p9 }
 0x148   : > { %2898 = shalt.err (!%p2895_p12)
}
 0x149   : > { %2355 = dma.hbm_to_vmem [thread:$0]  (!%p3280_p6), %s3941_s10, 16, %s555_s16, [#allocation21]  }
 0x14a   : > { %s3128_s25 = smov [#allocation25]   ;;  %s3129_s3 = smov [#allocation28]  }
 0x14b   : > { %s578_s29 = sshll.u32 %s3128_s25, 4  ;;  %s600_s19 = sshll.u32 %s3129_s3, 4  ;;  %s579_s29 = int_to_ptr.vmem [resolvable:$true] %s578_s29  ;;  %s601_s19 = int_to_ptr.vmem [resolvable:$true] %s600_s19 }
 0x14c   : > { %s2899_s30 = scalar_lea.hbm %s3943_s12, 16 }
 0x14d   : > { %p2900_p13 = scmp.ne.s32.totalorder %s3943_s12, %s2899_s30  ;;  %p2906_p3 = scmp.lt.u32.totalorder %s2899_s30, %s3943_s12 }
 0x14f   : > { %p2902_p0 = pnand %p2900_p13, %p3296_p8 }
 0x151   : > { %p2903_p1 = pneg %p2902_p0 }
 0x153   : > { %p2908_p2 = pnand %p2906_p3, %p2903_p1 }
 0x155   : > { %2911 = shalt.err (!%p2908_p2)
}
 0x156   : > { %s2912_s16 = scalar_lea.vmem %s579_s29, 16  ;;  %s2919_s17 = scalar_lea.vmem %s579_s29, 32 }
 0x157   : > { %p2913_p5 = scmp.ne.s32.totalorder %s579_s29, %s2912_s16  ;;  %p2920_p4 = scmp.lt.s32.totalorder %s579_s29, %s579_s29 }
 0x158   : > { %p2921_p10 = scmp.lt.s32.totalorder %s2919_s17, %s2912_s16 }
 0x159   : > { %p2915_p7 = pnand %p2913_p5, %p3296_p8 }
 0x15a   : > { %p2922_p11 = por %p2921_p10, %p2920_p4 }
 0x15b   : > { %p2916_p9 = pneg %p2915_p7 }
 0x15d   : > { %p2923_p12 = pnand %p2922_p11, %p2916_p9 }
 0x15f   : > { %2926 = shalt.err (!%p2923_p12)
}
 0x160   : > { %2361 = dma.hbm_to_vmem [thread:$0]  (!%p3280_p6), %s3943_s12, 16, %s579_s29, [#allocation24]  }
 0x161   : > { %s2927_s21 = scalar_lea.hbm %s3945_s14, 16 }
 0x162   : > { %p2928_p13 = scmp.ne.s32.totalorder %s3945_s14, %s2927_s21  ;;  %p2934_p3 = scmp.lt.u32.totalorder %s2927_s21, %s3945_s14 }
 0x164   : > { %p2930_p0 = pnand %p2928_p13, %p3296_p8 }
 0x166   : > { %p2931_p1 = pneg %p2930_p0 }
 0x168   : > { %p2936_p2 = pnand %p2934_p3, %p2931_p1 }
 0x16a   : > { %2939 = shalt.err (!%p2936_p2)
}
 0x16b   : > { %s2940_s22 = scalar_lea.vmem %s601_s19, 16  ;;  %s2947_s29 = scalar_lea.vmem %s601_s19, 32 }
 0x16c   : > { %p2941_p5 = scmp.ne.s32.totalorder %s601_s19, %s2940_s22  ;;  %p2948_p4 = scmp.lt.s32.totalorder %s601_s19, %s601_s19 }
 0x16d   : > { %p2949_p10 = scmp.lt.s32.totalorder %s2947_s29, %s2940_s22 }
 0x16e   : > { %p2943_p7 = pnand %p2941_p5, %p3296_p8 }
 0x16f   : > { %p2950_p11 = por %p2949_p10, %p2948_p4 }
 0x170   : > { %p2944_p9 = pneg %p2943_p7 }
 0x172   : > { %p2951_p12 = pnand %p2950_p11, %p2944_p9 }
 0x174   : > { %2954 = shalt.err (!%p2951_p12)
}
 0x175   : > { %2367 = dma.hbm_to_vmem [thread:$0]  (!%p3280_p6), %s3945_s14, 16, %s601_s19, [#allocation27]  }
 0x176   : > { %s3130_s17 = smov [#allocation31]   ;;  %s3986_s3 = sld [smem:[#allocation53_spill]] }
 0x177   : > { %s622_s0 = sshll.u32 %s3130_s17, 4  ;;  %s623_s0 = int_to_ptr.vmem [resolvable:$true] %s622_s0 }
 0x17c   : > { %s2955_s21 = scalar_lea.hbm %s3986_s3, 16 }
 0x17d   : > { %p2956_p13 = scmp.ne.s32.totalorder %s3986_s3, %s2955_s21  ;;  %p2962_p3 = scmp.lt.u32.totalorder %s2955_s21, %s3986_s3 }
 0x17f   : > { %p2958_p0 = pnand %p2956_p13, %p3296_p8 }
 0x181   : > { %p2959_p1 = pneg %p2958_p0 }
 0x183   : > { %p2964_p2 = pnand %p2962_p3, %p2959_p1 }
 0x185   : > { %2967 = shalt.err (!%p2964_p2)
}
 0x186   : > { %s2968_s19 = scalar_lea.vmem %s623_s0, 16  ;;  %s2975_s22 = scalar_lea.vmem %s623_s0, 32 }
 0x187   : > { %p2969_p5 = scmp.ne.s32.totalorder %s623_s0, %s2968_s19  ;;  %p2976_p4 = scmp.lt.s32.totalorder %s623_s0, %s623_s0 }
 0x188   : > { %p2977_p10 = scmp.lt.s32.totalorder %s2975_s22, %s2968_s19 }
 0x189   : > { %p2971_p7 = pnand %p2969_p5, %p3296_p8 }
 0x18a   : > { %p2978_p11 = por %p2977_p10, %p2976_p4 }
 0x18b   : > { %p2972_p9 = pneg %p2971_p7 }
 0x18d   : > { %p2979_p12 = pnand %p2978_p11, %p2972_p9 }
 0x18f   : > { %2982 = shalt.err (!%p2979_p12)
}
 0x190   : > { %s3987_s16 = sld [smem:[#allocation46_spill]]  ;;  %s3988_s17 = sld [smem:[#allocation45_spill]] }
 0x191   : > { %s3989_s27 = sld [smem:[#allocation44_spill]]  ;;  %s3990_s18 = sld [smem:[#allocation43_spill]] }
 0x192   : > { %s3991_s25 = sld [smem:[#allocation47_spill]] }
 0x193   : > { %2373 = dma.hbm_to_vmem [thread:$0]  (!%p3280_p6), %s3986_s3, 16, %s623_s0, [#allocation30]  }
 0x196   : > { %s1886_s21 = sadd.s32 4294967294, %s3987_s16   ;;  %s3616_s1 = sadd.s32 1, %s3987_s16  }
 0x197   : > { %s45_s26 = ssub.s32 %s3987_s16, %s3616_s1  ;;  %s48_s30 = sadd.s32 1, %s3988_s17 }
 0x198   : > { %p46_p8 = scmp.eq.s32.totalorder %s45_s26, 0  ;;  %p55_p13 = scmp.ne.s32.totalorder %s3988_s17, %s3989_s27 }
 0x199   : > { %p56_p0 = scmp.eq.s32.totalorder %s3987_s16, 0  ;;  %p61_p1 = scmp.ne.s32.totalorder %s3989_s27, %s3990_s18 }
 0x19a   : > { %s3627_s23 = scalar_select %p46_p8, %s3988_s17, %s48_s30  }
 0x19b   : > { %p3629_p3 = por %p56_p0, %p55_p13  ;;  %p3993_p2 = scmp.eq.s32.totalorder %s3991_s25, 0 }
 0x19c   : > { %p421_p5 = scmp.eq.s32.totalorder %s3991_s25, 1  ;;  %p427_p7 = scmp.eq.s32.totalorder %s1886_s21, 1 }
 0x19d   : > { %p3635_p6 = por %p3993_p2, %p61_p1  ;;  %p2398_p9 = scmp.lt.s32.totalorder %s3987_s16, 2 }
 0x19e   : > { %s633_s19 = sand.u32 1, %s3988_s17   ;;  %p3642_p4 = por %p421_p5, %p55_p13 }
 0x19f   : > { %p3646_p10 = por %p427_p7, %p61_p1  ;;  %s1905_s20 = sshll.u32 %s633_s19, 3 }
 0x1a0   : > { %s3995_s22 = scalar_select %p3642_p4, 1, 0 }
 0x1a1   : > { %s3996_s29 = scalar_select %p3646_p10, 1, 0 }
 0x1a2   : > { %s1906_s27 = sshll.u32 %s3987_s16, 7  ;;  %s3997_s30 = sld [smem:[#allocation49_spill]] }
 0x1a3   : > { %s637_s17 = scalar_lea.vmem [#allocation5], %s1905_s20  ;;  %p3660_p11 = pnand %p2398_p9, %p3629_p3 }
 0x1a4   : > { %s644_s25 = sshll.u32 %s637_s17, 4  ;;  %s634_s16 = scalar_lea.sflag [#allocation6], %s633_s19  ;;  %s3656_s25 = int_to_ptr.vmem [resolvable:$true] %s644_s25 }
 0x1a5   : > { %p2985_p8 = pneg %p3660_p11 }
 0x1a8   : > { %s3654_s2 = scalar_lea.hbm %s3997_s30, %s1906_s27  ;;  %s2988_s18 = scalar_lea.hbm %s3997_s30, 256 }
 0x1a9   : > { %s2983_s3 = scalar_lea.hbm %s3654_s2, 128  ;;  %p2989_p1 = scmp.lt.u32.totalorder %s3654_s2, %s3997_s30 }
 0x1aa   : > { %p2984_p12 = scmp.ne.s32.totalorder %s3654_s2, %s2983_s3  ;;  %p2990_p3 = scmp.lt.u32.totalorder %s2988_s18, %s2983_s3 }
 0x1ab   : > { %p2992_p5 = scmp.lt.u32.totalorder %s2983_s3, %s3654_s2 }
 0x1ac   : > { %p2986_p13 = pnand %p2985_p8, %p2984_p12  ;;  %p2991_p2 = por %p2990_p3, %p2989_p1 }
 0x1ae   : > { %p2987_p0 = pneg %p2986_p13  ;;  %p2993_p7 = por %p2992_p5, %p2991_p2 }
 0x1b0   : > { %p2994_p9 = pnand %p2993_p7, %p2987_p0 }
 0x1b2   : > { %2997 = shalt.err (!%p2994_p9)
}
 0x1b3   : > { %s2998_s19 = scalar_lea.vmem %s3656_s25, 128  ;;  %s3131_s17 = smov [#allocation5]  }
 0x1b4   : > { %p2999_p12 = scmp.ne.s32.totalorder %s3656_s25, %s2998_s19  ;;  %s3003_s20 = sshll.u32 %s3131_s17, 4  ;;  %s3004_s20 = int_to_ptr.vmem [resolvable:$false] %s3003_s20 }
 0x1b5   : > { %s3005_s27 = scalar_lea.vmem %s3004_s20, 256  ;;  %p3006_p4 = scmp.lt.s32.totalorder %s3656_s25, %s3004_s20 }
 0x1b6   : > { %p3001_p13 = pnand %p2999_p12, %p2985_p8  ;;  %p3007_p1 = scmp.lt.s32.totalorder %s3005_s27, %s2998_s19 }
 0x1b8   : > { %p3002_p10 = pneg %p3001_p13  ;;  %p3008_p3 = por %p3007_p1, %p3006_p4 }
 0x1ba   : > { %p3009_p2 = pnand %p3008_p3, %p3002_p10 }
 0x1bc   : > { %3012 = shalt.err (!%p3009_p2)
}
 0x1bd   : > { %2377 = dma.hbm_to_vmem [thread:$0]  (!%p3660_p11), %s3654_s2, 128, %s3656_s25, %s634_s16  }
 0x1be   : > { %s3999_s3 = sld [smem:[#allocation48_spill]] }
 0x1c4   : > { %p4000_p0 = scmp.ne.s32.totalorder %s3999_s3, 0 }
 0x1c5   : > { %s4001_s18 = sld [smem:[#allocation44_spill]] (!%p4000_p0) }
 0x1c6   : > { %653 = sbr.rel (%p4000_p0) target bundleno = 2729 (0xaa9), region = 88 }
 0x1cb   : > { %s3692_s24 = sand.u32 (!%p4000_p0), 1, %s4001_s18  }
 0x1cc   : > { %s1908_s26 = sshll.u32 (!%p4000_p0), %s3692_s24, 3  ;;  %s656_s19 = scalar_lea.sflag (!%p4000_p0), [#allocation6], %s3692_s24 }
 0x1cd   : > { %s3698_s17 = scalar_lea.vmem [#allocation5], %s1908_s26 }
 0x1ce   : > { %3058 = dma.done.wait (%p3635_p6), %s656_s19, 128  }
 0x1cf   : > { %3060 = vsyncadd (%p3635_p6), %s656_s19, 4294967168  ;;  %s4002_s2 = sld [smem:[#allocation47_spill]] }
 0x1d5   : > { %p4003_p4 = scmp.eq.s32.totalorder %s4002_s2, 0 }
 0x1d7   : > { %3062 = dma.done.wait (%p4003_p4), [#allocation9], 2112   ;;  %p4004_p10 = pmov %p4003_p4 }
 0x1d8   : > { %p4005_p11 = pmov %p4003_p4 }
 0x1d9   : > { %3064 = vsyncadd (%p4004_p10), [#allocation9], 4294965184 }
 0x1da   : > { %3066 = dma.done.wait (%p4005_p11), [#allocation12], 1040   ;;  %p4006_p8 = pmov %p4003_p4 }
 0x1db   : > { %p4007_p5 = pmov %p4003_p4 }
 0x1dc   : > { %3068 = vsyncadd (%p4006_p8), [#allocation12], 4294966256 }
 0x1dd   : > { %3070 = dma.done.wait (%p4007_p5), [#allocation15], 144   ;;  %p4008_p7 = pmov %p4003_p4 }
 0x1de   : > { %p4009_p6 = pmov %p4003_p4 }
 0x1df   : > { %3072 = vsyncadd (%p4008_p7), [#allocation15], 4294967152 }
 0x1e0   : > { %3074 = dma.done.wait (%p4009_p6), [#allocation18], 1040   ;;  %p4010_p9 = pmov %p4003_p4 }
 0x1e1   : > { %p4011_p12 = pmov %p4003_p4 }
 0x1e2   : > { %3076 = vsyncadd (%p4010_p9), [#allocation18], 4294966256 }
 0x1e3   : > { %3078 = dma.done.wait (%p4011_p12), [#allocation21], 2064   ;;  %p4012_p13 = pmov %p4003_p4 }
 0x1e4   : > { %p4013_p1 = pmov %p4003_p4 }
 0x1e5   : > { %3080 = vsyncadd (%p4012_p13), [#allocation21], 4294965232 }
 0x1e6   : > { %3082 = dma.done.wait (%p4013_p1), [#allocation24], 2064   ;;  %p4014_p3 = pmov %p4013_p1 }
 0x1e7   : > { %p4015_p2 = pmov %p4013_p1 }
 0x1e8   : > { %3084 = vsyncadd (%p4014_p3), [#allocation24], 4294965232 }
 0x1e9   : > { %3086 = dma.done.wait (%p4015_p2), [#allocation27], 32   ;;  %p4016_p0 = pmov %p4013_p1 }
 0x1eb   : > { %3088 = vsyncadd (%p4016_p0), [#allocation27], 4294967264  ;;  %p4017_p4 = pmov %p4016_p0 }
 0x1ec   : > { %p4018_p10 = pmov %p4016_p0 }
 0x1ed   : > { %3090 = dma.done.wait (%p4017_p4), [#allocation30], 32  }
 0x1ee   : > { %3092 = vsyncadd (%p4018_p10), [#allocation30], 4294967264  ;;  %vm875_vm0 = vcmask 518144   ;;  %v3132_v0 = vmov 0.0|0.0   ;;  %vm3133_vm1 = vmmov 0   ;;  %v3134_v1 = vmov 0.0  }
 0x1ef   : > { %2161 = vmatprep.subr.bf16.mxu0 %v3132_v0  ;;  %2050 = vmatprep.mubr.msk.f32.mxu0 %vm3133_vm1, %v3134_v1  ;;  %876 = vst.msk [vmem:[#allocation2] sm:$0x7] %vm875_vm0, %v3134_v1  ;;  %v775_v2 = vld [vmem:[#allocation8] sm:$0xff]  ;;  %v776_v3 = vld [vmem:[#allocation8 + $0x8] sm:$0xff]  ;;  %v777_v4 = vld [vmem:[#allocation8 + $0x10] sm:$0xff]  ;;  %v3135_v39 = vmov 69   ;;  %v862_v41 = vlaneseq }
 0x1f0   : > { %2185 = vmatprep.subr.bf16.mxu1 %v3132_v0  ;;  %2069 = vmatprep.mubr.msk.f32.mxu1 %vm3133_vm1, %v3134_v1  ;;  %v2162_v5 = vpack.c.bf16 %v776_v3, %v775_v2  ;;  %v778_v6 = vld [vmem:[#allocation8 + $0x18] sm:$0xff]  ;;  %v779_v8 = vld [vmem:[#allocation8 + $0x20] sm:$0xff]  ;;  %v780_v9 = vld [vmem:[#allocation8 + $0x28] sm:$0xff]  ;;  %v3136_v40 = vmov 65   ;;  %vm877_vm2 = vcmask 523264   ;;  %s3145_s0 = smov 64  }
 0x1f1   : > { %v2165_v7 = vpack.c.bf16 %v778_v6, %v777_v4  ;;  %v2168_v10 = vpack.c.bf16 %v780_v9, %v779_v8  ;;  %v781_v11 = vld [vmem:[#allocation8 + $0x30] sm:$0xff]  ;;  %v782_v12 = vld [vmem:[#allocation8 + $0x38] sm:$0xff]  ;;  %v783_v14 = vld [vmem:[#allocation8 + $0x40] sm:$0xff]  ;;  %2488 = vset.pattern.permute.xlu1 %v3135_v39  ;;  %2486 = vset.pattern.permute.xlu0 %v3136_v40  ;;  %v863_v42 = vshrl.u32 %v862_v41, 7  ;;  %vm1040_vm4 = vcmask 1048064   ;;  %s1946_s25 = sshll.u32 %s4002_s2, 7 }
 0x1f2   : > { %2163 = vmatpush3.bf16.msra.mxu0 %v2162_v5  ;;  %v2171_v13 = vpack.c.bf16 %v782_v12, %v781_v11  ;;  %v784_v15 = vld [vmem:[#allocation8 + $0x48] sm:$0xff]  ;;  %v785_v17 = vld [vmem:[#allocation8 + $0x50] sm:$0xff]  ;;  %v786_v18 = vld [vmem:[#allocation8 + $0x58] sm:$0xff]  ;;  %vm3817_vm5 = vcmp.lt.s32.totalorder %v862_v41, 512  ;;  %s773_s21 = scalar_lea.vmem [#allocation32], %s1908_s26  ;;  %s4021_s3 = sld [smem:[#allocation54_spill]] }
 0x1f3   : > { %2164 = vmatprep.subr.bf16.mxu0 %v3132_v0  ;;  %v2174_v16 = vpack.c.bf16 %v784_v15, %v783_v14  ;;  %v2177_v19 = vpack.c.bf16 %v786_v18, %v785_v17  ;;  %v787_v20 = vld [vmem:[#allocation8 + $0x60] sm:$0xff]  ;;  %v788_v21 = vld [vmem:[#allocation8 + $0x68] sm:$0xff]  ;;  %v789_v23 = vld [vmem:[#allocation8 + $0x70] sm:$0xff]  ;;  %v864_v43 = vsub.s32 3, %v863_v42  ;;  %v882_v47 = vsub.s32 0, %v863_v42  ;;  %s1664_s16 = sshll.u32 %s773_s21, 4  ;;  %s3889_s16 = int_to_ptr.vmem [resolvable:$true] %s1664_s16 }
 0x1f4   : > { %v2180_v22 = vpack.c.bf16 %v788_v21, %v787_v20  ;;  %v790_v24 = vld [vmem:[#allocation8 + $0x78] sm:$0xff]  ;;  %v907_v27 = vld [vmem:[#allocation13] sm:$0xff]  ;;  %v908_v28 = vld [vmem:[#allocation13 + $0x8] sm:$0xff]  ;;  %v889_v49 = vsub.s32 1, %v863_v42  ;;  %v896_v52 = vsub.s32 2, %v863_v42  ;;  %v3137_v15 = vmov 71  }
 0x1f5   : > { %v2183_v25 = vpack.c.bf16 %v790_v24, %v789_v23  ;;  %v3751_v26 = vld [vmem:[%s3698_s17] sm:$0xff]  ;;  %v2186_v30 = vpack.c.bf16 %v908_v28, %v907_v27  ;;  %v911_v33 = vld [vmem:[#allocation13 + $0x20] sm:$0xff]  ;;  %v861_v44 = vld [vmem:[#allocation10] sm:$0xf]  ;;  %v3140_v20 = vmov 66   ;;  %v3141_v21 = vmov 68  }
 0x1f6   : > { %2166 = vmatpush3.bf16.msra.mxu0 %v2165_v7  ;;  %v909_v29 = vld [vmem:[#allocation13 + $0x10] sm:$0xff]  ;;  %v910_v31 = vld [vmem:[#allocation13 + $0x18] sm:$0xff]  ;;  %v912_v34 = vld [vmem:[#allocation13 + $0x28] sm:$0xff]  ;;  %v865_v46 = vrot.slane %v861_v44, %v864_v43  ;;  %v883_v51 = vrot.slane %v861_v44, %v882_v47  ;;  %v890_v54 = vrot.slane %v861_v44, %v889_v49  ;;  %v897_v59 = vrot.slane %v861_v44, %v896_v52  ;;  %s1651_s19 = scalar_lea.sflag [#allocation7], %s3692_s24  ;;  %s3013_s17 = scalar_lea.vmem %s3889_s16, 128 }
 0x1f7   : > { %2167 = vmatprep.subr.bf16.mxu0 %v3132_v0  ;;  %2187 = vmatpush3.bf16.msra.mxu1 %v2186_v30  ;;  %v2189_v32 = vpack.c.bf16 %v910_v31, %v909_v29  ;;  %v2192_v35 = vpack.c.bf16 %v912_v34, %v911_v33  ;;  %v913_v36 = vld [vmem:[#allocation13 + $0x30] sm:$0xff]  ;;  %v914_v37 = vld [vmem:[#allocation13 + $0x38] sm:$0xff]  ;;  %v3143_v24 = vmov 70   ;;  %v3144_v28 = vmov 75   ;;  %v1935_v39 = vld [vmem:[#allocation16 + $0x6] ss:$0 sm:$0xff]  ;;  %p3014_p11 = scmp.ne.s32.totalorder %s3889_s16, %s3013_s17 }
 0x1f8   : > { %2188 = vmatprep.subr.bf16.mxu1 %v3132_v0  ;;  %v2195_v38 = vpack.c.bf16 %v914_v37, %v913_v36  ;;  %v1926_v53 = vld [vmem:[#allocation11] ss:$0 sm:$0xff]  ;;  %v1932_v37 = vld [vmem:[#allocation16 + $0x3] ss:$0 sm:$0xff]  ;;  %v1931_v42 = vld [vmem:[#allocation16 + $0x2] ss:$0 sm:$0xff]  ;;  %s3887_s18 = scalar_lea.hbm %s4021_s3, %s1946_s25 }
 0x1f9   : > { %v1930_v43 = vld [vmem:[#allocation16 + $0x1] ss:$0 sm:$0xff]  ;;  %v1936_v44 = vld [vmem:[#allocation16 + $0x7] ss:$0 sm:$0xff]  ;;  %v1934_v52 = vld [vmem:[#allocation16 + $0x5] ss:$0 sm:$0xff] }
 0x1fa   : > { %2169 = vmatpush3.bf16.msra.mxu0 %v2168_v10  ;;  %v1928_v10 = vld [vmem:[#allocation14] ss:$0 sm:$0xff]  ;;  %p4022_p8 = scmp.ne.s32.totalorder %s3995_s22, 0  ;;  %s3152_s26 = smov [#allocation32]  }
 0x1fb   : > { %2170 = vmatprep.subr.bf16.mxu0 %v3132_v0  ;;  %2190 = vmatpush3.bf16.msra.mxu1 %v2189_v32  ;;  %s3017_s2 = sshll.u32 %s3152_s26, 4  ;;  %s3018_s2 = int_to_ptr.vmem [resolvable:$false] %s3017_s2 }
 0x1fc   : > { %2191 = vmatprep.subr.bf16.mxu1 %v3132_v0  ;;  %p3015_p5 = pnand %p3014_p11, %p4022_p8  ;;  %p3020_p6 = scmp.lt.s32.totalorder %s3889_s16, %s3018_s2 }
 0x1fe   : > { %2172 = vmatpush3.bf16.msra.mxu0 %v2171_v13  ;;  %p3016_p7 = pneg %p3015_p5 }
 0x1ff   : > { %2173 = vmatprep.subr.bf16.mxu0 %v3132_v0  ;;  %2193 = vmatpush3.bf16.msra.mxu1 %v2192_v35  ;;  %v1929_v35 = vld [vmem:[#allocation16] ss:$0 sm:$0xff] }
 0x200   : > { %2194 = vmatprep.subr.bf16.mxu1 %v3132_v0 }
 0x202   : > { %2175 = vmatpush3.bf16.msra.mxu0 %v2174_v16  ;;  %v3138_v16 = vmov 67  }
 0x203   : > { %2176 = vmatprep.subr.bf16.mxu0 %v3132_v0  ;;  %2196 = vmatpush3.bf16.msra.mxu1 %v2195_v38  ;;  %v1933_v38 = vld [vmem:[#allocation16 + $0x4] ss:$0 sm:$0xff] }
 0x204   : > { %2197 = vmatprep.subr.bf16.mxu1 %v3132_v0 }
 0x206   : > { %2178 = vmatpush3.bf16.msra.mxu0 %v2177_v19  ;;  %v3139_v19 = vmov 64  }
 0x207   : > { %2179 = vmatprep.subr.bf16.mxu0 %v3132_v0 }
 0x20a   : > { %2181 = vmatpush3.bf16.msra.mxu0 %v2180_v22  ;;  %v3142_v22 = vmov 73  }
 0x20b   : > { %2182 = vmatprep.subr.bf16.mxu0 %v3132_v0 }
 0x20e   : > { %2184 = vmatpush3.bf16.msra.mxu0 %v2183_v25 }
 0x20f   : > { %2209 = vmatprep.subr.bf16.mxu0 %v3132_v0 }
 0x211   : > { %2051 = vmatmul.mubr.f32.vlgmr.msra.gmra.mrb[0].mxu0 %v3751_v26 }
 0x212   : > { %2123 = vmatprep.mubr.msk.f32.mxu0 %vm3133_vm1, %v3134_v1 }
 0x2e4   : > { %v3762_v45 = vpop.f32.mrb[0].mxu0 }
 0x2e5   : > { %878 = vst.msk [vmem:[#allocation2 + $0x3] sm:$0xff] %vm877_vm2, %v3762_v45  ;;  %v2052_v48 = vpop.f32.mrb[1].mxu0  ;;  %v866_v50 = vmul.f32 %v865_v46, %v3762_v45 }
 0x2e7   : > { %v874_v57 = vadd.f32 %v1926_v53, %v866_v50 }
 0x2ec   : > { %v879_v55 = vld [vmem:[#allocation2] sm:$0xff] }
 0x2ed   : > { %v886_v56 = vld [vmem:[#allocation2 + $0x1] sm:$0xff]  ;;  %v884_v58 = vmul.f32 %v883_v51, %v879_v55 }
 0x2ee   : > { %v893_v60 = vld [vmem:[#allocation2 + $0x2] sm:$0xff]  ;;  %v891_v62 = vmul.f32 %v890_v54, %v886_v56 }
 0x2ef   : > { %v885_v61 = vadd.f32 %v884_v58, %v874_v57  ;;  %v898_v2 = vmul.f32 %v897_v59, %v893_v60 }
 0x2f1   : > { %v892_v63 = vadd.f32 %v891_v62, %v885_v61 }
 0x2f3   : > { %v899_v3 = vadd.f32 %v898_v2, %v892_v63 }
 0x2f5   : > { %v900_v4 = vsub.f32 0.0, %v899_v3 }
 0x2f7   : > { %v901_v5 = vmul.f32 1.442695, %v900_v4 }
 0x2f9   : > { %2503 = vpow2.f32 %v901_v5 }
 0x303   : > { %v2504_v6 = vpop.eup %2503 }
 0x304   : > { %v903_v7 = vadd.f32 1.0, %v2504_v6 }
 0x306   : > { %2505 = vrcp.f32 %v903_v7 }
 0x310   : > { %v2506_v8 = vpop.eup %2505 }
 0x311   : > { %v3767_v9 = vmul.f32 %v2506_v8, %v899_v3 }
 0x313   : > { %2070 = vmatmul.mubr.msk.f32.vlgmr.msra.gmra.mrb[0].mxu1 %vm877_vm2, %v3767_v9 }
 0x314   : > { %2088 = vmatprep.mubr.msk.f32.mxu1 %vm3133_vm1, %v3134_v1 }
 0x3e6   : > { %v3773_v11 = vpop.f32.mrb[0].mxu1 }
 0x3e7   : > { %1119 = vperm.xlu1 %2488, %v3773_v11   ;;  %1043 = vperm.xlu0 %2486, %v3773_v11   ;;  %v2071_v12 = vpop.f32.mrb[1].mxu1  ;;  %v995_v13 = vadd.f32 %v1928_v10, %v3773_v11 }
 0x3e9   : > { %v997_v14 = vand.u32 2147483647, %v995_v13  ;;  %v996_v34 = vmax.f32 %v995_v13, 0.0 }
 0x3eb   : > { %2489 = vset.pattern.permute.xlu1 %v3137_v15  ;;  %2487 = vset.pattern.permute.xlu0 %v3138_v16  ;;  %v998_v17 = vsub.f32 0.0, %v997_v14 }
 0x3ec   : > { %1157 = vperm.xlu1 %2489, %v3773_v11   ;;  %1081 = vperm.xlu0 %2487, %v3773_v11  }
 0x3ed   : > { %v999_v18 = vmul.f32 1.442695, %v998_v17 }
 0x3ef   : > { %2507 = vpow2.f32 %v999_v18 }
 0x3f0   : > { %2490 = vset.pattern.permute.xlu1 %v3139_v19  ;;  %2491 = vset.pattern.permute.xlu0 %v3140_v20 }
 0x3f1   : > { %1023 = vperm.xlu1 %2490, %v3773_v11   ;;  %1062 = vperm.xlu0 %2491, %v3773_v11  }
 0x3f5   : > { %2492 = vset.pattern.permute.xlu1 %v3141_v21  ;;  %2494 = vset.pattern.permute.xlu0 %v3142_v22 }
 0x3f6   : > { %1100 = vperm.xlu1 %2492, %v3773_v11  }
 0x3f9   : > { %v2508_v23 = vpop.eup %2507 }
 0x3fa   : > { %2493 = vset.pattern.permute.xlu1 %v3143_v24  ;;  %v1001_v25 = vadd.f32 1.0, %v2508_v23  ;;  %v1004_v27 = vmul.f32 -0.5, %v2508_v23  ;;  %v1007_v30 = vand.u32 2147483647, %v2508_v23 }
 0x3fb   : > { %1138 = vperm.xlu1 %2493, %v3773_v11  }
 0x3fc   : > { %2509 = vlog2.f32 %v1001_v25  ;;  %v1005_v29 = vadd.f32 1.0, %v1004_v27  ;;  %vm1008_vm3 = vcmp.lt.f32.partialorder %v1007_v30, 0.0004427343  ;;  %v3146_v25 = vmov 79  }
 0x3fd   : > { %v3148_v30 = vmov 76  }
 0x3fe   : > { %v1006_v33 = vmul.f32 %v2508_v23, %v1005_v29  ;;  %v3147_v29 = vmov 77  }
 0x3ff   : > { %2495 = vset.pattern.permute.xlu1 %v3144_v28 }
 0x406   : > { %v2510_v31 = vpop.eup %2509 }
 0x407   : > { %v1003_v32 = vmul.f32 0.6931472, %v2510_v31 }
 0x409   : > { %v1009_v36 = vsel %vm1008_vm3, %v1006_v33, %v1003_v32  ;;  %v3149_v32 = vmov 72   ;;  %v3150_v33 = vmov 74  }
 0x40a   : > { %v1010_v40 = vadd.f32 %v1009_v36, %v996_v34 }
 0x40c   : > { %v1072_v46 = vmul.f32 %v1932_v37, %v1010_v40  ;;  %v1095_v47 = vmul.f32 %v1933_v38, %v1010_v40  ;;  %v1133_v48 = vmul.f32 %v1935_v39, %v1010_v40  ;;  %v1017_v49 = vmul.f32 %v1929_v35, %v1010_v40 }
 0x40d   : > { %v1057_v50 = vmul.f32 %v1931_v42, %v1010_v40  ;;  %v1033_v51 = vmul.f32 %v1930_v43, %v1010_v40  ;;  %v1148_v56 = vmul.f32 %v1936_v44, %v1010_v40  ;;  %v1110_v60 = vmul.f32 %v1934_v52, %v1010_v40 }
 0x40e   : > { %v1073_v53 = vmul.f32 1.442695, %v1072_v46  ;;  %v1096_v54 = vmul.f32 1.442695, %v1095_v47  ;;  %v1134_v55 = vmul.f32 1.442695, %v1133_v48  ;;  %v1011_v10 = vmul.f32 %v1010_v40, %v3767_v9 }
 0x40f   : > { %v1018_v57 = vmul.f32 1.442695, %v1017_v49  ;;  %v1058_v58 = vmul.f32 1.442695, %v1057_v50  ;;  %v1034_v59 = vmul.f32 1.442695, %v1033_v51 }
 0x410   : > { %2511 = vpow2.f32 %v1073_v53  ;;  %v1149_v61 = vmul.f32 1.442695, %v1148_v56  ;;  %v1111_v62 = vmul.f32 1.442695, %v1110_v60  ;;  %v3151_v38 = vmov 78  }
 0x411   : > { %2513 = vpow2.f32 %v1096_v54 }
 0x412   : > { %2515 = vpow2.f32 %v1134_v55 }
 0x413   : > { %2517 = vpow2.f32 %v1018_v57 }
 0x414   : > { %2519 = vpow2.f32 %v1058_v58 }
 0x415   : > { %2521 = vpow2.f32 %v1034_v59 }
 0x416   : > { %2523 = vpow2.f32 %v1149_v61  ;;  %v1308_v61 = vsub.f32 0.0, %v3762_v45 }
 0x417   : > { %2525 = vpow2.f32 %v1111_v62 }
 0x41a   : > { %v2512_v63 = vpop.eup %2511 }
 0x41b   : > { %v2514_v2 = vpop.eup %2513  ;;  %1076 = vrot.lane.b32.xlu1 %v2512_v63, %s3145_s0 }
 0x41c   : > { %v2516_v3 = vpop.eup %2515  ;;  %1098 = vst.msk [vmem:[#allocation3 + $0x10] sm:$0xff] %vm877_vm2, %v2514_v2 }
 0x41d   : > { %v2518_v4 = vpop.eup %2517  ;;  %1136 = vst.msk [vmem:[#allocation3 + $0x18] sm:$0xff] %vm877_vm2, %v2516_v3 }
 0x41e   : > { %v2520_v5 = vpop.eup %2519  ;;  %1020 = vst.msk [vmem:[#allocation3] sm:$0xff] %vm877_vm2, %v2518_v4  ;;  %v1309_v4 = vmul.f32 1.442695, %v1308_v61 }
 0x41f   : > { %v2522_v6 = vpop.eup %2521  ;;  %1060 = vst.msk [vmem:[#allocation3 + $0x8] sm:$0xff] %vm877_vm2, %v2520_v5 }
 0x420   : > { %v2524_v7 = vpop.eup %2523  ;;  %1037 = vrot.lane.b32.xlu0 %v2522_v6, %s3145_s0  ;;  %2527 = vpow2.f32 %v1309_v4 }
 0x421   : > { %1152 = vrot.lane.b32.xlu1 %v2524_v7, %s3145_s0  ;;  %v2526_v8 = vpop.eup %2525 }
 0x424   : > { %1114 = vrot.lane.b32.xlu0 %v2526_v8, %s3145_s0 }
 0x466   : > { %v1120_v12 = vpop.permute.xlu1 %1119  ;;  %v1044_v13 = vpop.permute.xlu0 %1043 }
 0x467   : > { %v1046_v14 = vmul.f32 %v1044_v13, %v1011_v10  ;;  %v1122_v15 = vmul.f32 %v1120_v12, %v1011_v10 }
 0x469   : > { %1048 = vrot.lane.b32.xlu0 %v1046_v14, %s3145_s0 }
 0x46b   : > { %v1158_v16 = vpop.permute.xlu1 %1157  ;;  %v1082_v17 = vpop.permute.xlu0 %1081 }
 0x46c   : > { %v1084_v18 = vmul.f32 %v1082_v17, %v1011_v10  ;;  %v1160_v19 = vmul.f32 %v1158_v16, %v1011_v10 }
 0x46d   : > { %1124 = vrot.lane.b32.xlu0 %v1122_v15, %s3145_s0 }
 0x46e   : > { %1086 = vrot.lane.b32.xlu1 %v1084_v18, %s3145_s0 }
 0x470   : > { %v1024_v20 = vpop.permute.xlu1 %1023  ;;  %v1063_v21 = vpop.permute.xlu0 %1062 }
 0x471   : > { %v1026_v22 = vmul.f32 %v1024_v20, %v1011_v10  ;;  %v1065_v23 = vmul.f32 %v1063_v21, %v1011_v10  ;;  %1251 = vperm.xlu0 %2494, %v3773_v11   ;;  %v2528_v20 = vpop.eup %2527  ;;  %v1320_v21 = vld [vmem:[#allocation19] sm:$0xff] }
 0x472   : > { %1162 = vrot.lane.b32.xlu1 %v1160_v19, %s3145_s0 }
 0x473   : > { %1027 = vst.msk [vmem:[#allocation4] sm:$0xff] %vm877_vm2, %v1026_v22  ;;  %1066 = vst.msk [vmem:[#allocation4 + $0x8] sm:$0xff] %vm877_vm2, %v1065_v23  ;;  %v1321_v22 = vld [vmem:[#allocation19 + $0x8] sm:$0xff] }
 0x474   : > { %v2198_v23 = vpack.c.bf16 %v1321_v22, %v1320_v21  ;;  %v1437_v21 = vld [vmem:[#allocation20 + $0x20] sm:$0xff]  ;;  %v1438_v22 = vld [vmem:[#allocation20 + $0x28] sm:$0xff] }
 0x475   : > { %v1101_v24 = vpop.permute.xlu1 %1100  ;;  %2497 = vset.pattern.permute.xlu0 %v3146_v25 }
 0x476   : > { %v1103_v27 = vmul.f32 %v1101_v24, %v1011_v10  ;;  %1267 = vperm.xlu1 %2495, %v3773_v11   ;;  %1299 = vperm.xlu0 %2497, %v3773_v11   ;;  %v1311_v24 = vadd.f32 1.0, %v2528_v20 }
 0x477   : > { %2199 = vmatpush3.bf16.msra.mxu1 %v2198_v23  ;;  %v2216_v23 = vpack.c.bf16 %v1438_v22, %v1437_v21 }
 0x478   : > { %1104 = vst.msk [vmem:[#allocation4 + $0x10] sm:$0xff] %vm877_vm2, %v1103_v27  ;;  %2200 = vmatprep.subr.bf16.mxu1 %v3132_v0  ;;  %2529 = vrcp.f32 %v1311_v24 }
 0x47a   : > { %v1139_v28 = vpop.permute.xlu1 %1138  ;;  %2496 = vset.pattern.permute.xlu1 %v3147_v29  ;;  %2500 = vset.pattern.permute.xlu0 %v3148_v30 }
 0x47b   : > { %v1141_v31 = vmul.f32 %v1139_v28, %v1011_v10  ;;  %1283 = vperm.xlu1 %2496, %v3773_v11   ;;  %1277 = vperm.xlu0 %2500, %v3773_v11  }
 0x47d   : > { %1142 = vst.msk [vmem:[#allocation4 + $0x18] sm:$0xff] %vm877_vm2, %v1141_v31 }
 0x47f   : > { %2498 = vset.pattern.permute.xlu1 %v3149_v32  ;;  %2502 = vset.pattern.permute.xlu0 %v3146_v25 }
 0x480   : > { %1245 = vperm.xlu1 %2498, %v3773_v11  }
 0x484   : > { %2499 = vset.pattern.permute.xlu1 %v3150_v33 }
 0x485   : > { %1261 = vperm.xlu1 %2499, %v3773_v11  }
 0x489   : > { %2501 = vset.pattern.permute.xlu1 %v3151_v38 }
 0x48d   : > { %v1077_v34 = vpop.permute.xlu1 %1076 }
 0x48e   : > { %1079 = vst.msk [vmem:[#allocation3 + $0x8] sm:$0xff] %vm1040_vm4, %v1077_v34 }
 0x492   : > { %v1038_v35 = vpop.permute.xlu0 %1037 }
 0x493   : > { %1041 = vst.msk [vmem:[#allocation3] sm:$0xff] %vm1040_vm4, %v1038_v35  ;;  %v1153_v36 = vpop.permute.xlu1 %1152 }
 0x494   : > { %1155 = vst.msk [vmem:[#allocation3 + $0x18] sm:$0xff] %vm1040_vm4, %v1153_v36  ;;  %v1322_v36 = vld [vmem:[#allocation19 + $0x10] sm:$0xff] }
 0x496   : > { %v1115_v37 = vpop.permute.xlu0 %1114 }
 0x497   : > { %1117 = vst.msk [vmem:[#allocation3 + $0x10] sm:$0xff] %vm1040_vm4, %v1115_v37  ;;  %v1323_v37 = vld [vmem:[#allocation19 + $0x18] sm:$0xff] }
 0x49e   : > { %v1166_v44 = vld [vmem:[#allocation3] ss:$8 sm:$0xf]  ;;  %v1177_v50 = vld [vmem:[#allocation3 + $0x1] ss:$8 sm:$0xf] }
 0x49f   : > { %v1167_v46 = vmul.f32 0.0, %v1166_v44  ;;  %v1185_v54 = vld [vmem:[#allocation3 + $0x2] ss:$8 sm:$0xf] }
 0x4a0   : > { %v1193_v58 = vld [vmem:[#allocation3 + $0x3] ss:$8 sm:$0xf]  ;;  %v1201_v63 = vld [vmem:[#allocation3 + $0x4] ss:$8 sm:$0xf] }
 0x4a1   : > { %v1209_v6 = vld [vmem:[#allocation3 + $0x5] ss:$8 sm:$0xf]  ;;  %v1217_v12 = vld [vmem:[#allocation3 + $0x6] ss:$8 sm:$0xf] }
 0x4a2   : > { %v1225_v16 = vld [vmem:[#allocation3 + $0x7] ss:$8 sm:$0xf] }
 0x4a3   : > { %v1324_v44 = vld [vmem:[#allocation19 + $0x20] sm:$0xff] }
 0x4db   : > { %v1049_v39 = vpop.permute.xlu0 %1048 }
 0x4dc   : > { %1051 = vst.msk [vmem:[#allocation4] sm:$0xff] %vm1040_vm4, %v1049_v39  ;;  %v2201_v39 = vpack.c.bf16 %v1323_v37, %v1322_v36  ;;  %v1445_v37 = vld [vmem:[#allocation20 + $0x60] sm:$0xff] }
 0x4de   : > { %2202 = vmatpush3.bf16.msra.mxu1 %v2201_v39 }
 0x4df   : > { %v1125_v40 = vpop.permute.xlu0 %1124  ;;  %2203 = vmatprep.subr.bf16.mxu1 %v3132_v0 }
 0x4e0   : > { %1127 = vst.msk [vmem:[#allocation4 + $0x10] sm:$0xff] %vm1040_vm4, %v1125_v40  ;;  %v1087_v42 = vpop.permute.xlu1 %1086 }
 0x4e1   : > { %1089 = vst.msk [vmem:[#allocation4 + $0x8] sm:$0xff] %vm1040_vm4, %v1087_v42  ;;  %v2530_v42 = vpop.eup %2529 }
 0x4e4   : > { %v1163_v43 = vpop.permute.xlu1 %1162 }
 0x4e5   : > { %1165 = vst.msk [vmem:[#allocation4 + $0x18] sm:$0xff] %vm1040_vm4, %v1163_v43  ;;  %v1314_v43 = vmul.f32 %v2530_v42, %v3762_v45  ;;  %v1448_v42 = vld [vmem:[#allocation20 + $0x78] sm:$0xff] }
 0x4ec   : > { %v1168_v48 = vld [vmem:[#allocation4] ss:$8 sm:$0xf]  ;;  %v1180_v52 = vld [vmem:[#allocation4 + $0x1] ss:$8 sm:$0xf] }
 0x4ed   : > { %v1169_v49 = vadd.f32 %v1168_v48, %v1167_v46  ;;  %v1188_v56 = vld [vmem:[#allocation4 + $0x2] ss:$8 sm:$0xf]  ;;  %v1196_v60 = vld [vmem:[#allocation4 + $0x3] ss:$8 sm:$0xf] }
 0x4ee   : > { %v1204_v3 = vld [vmem:[#allocation4 + $0x4] ss:$8 sm:$0xf]  ;;  %v1212_v8 = vld [vmem:[#allocation4 + $0x5] ss:$8 sm:$0xf] }
 0x4ef   : > { %v1178_v51 = vmul.f32 %v1177_v50, %v1169_v49  ;;  %1174 = vst.msk [vmem:[#allocation4] ss:$8 sm:$0xf] %vm3817_vm5, %v1169_v49  ;;  %v1220_v14 = vld [vmem:[#allocation4 + $0x6] ss:$8 sm:$0xf] }
 0x4f0   : > { %v1228_v18 = vld [vmem:[#allocation4 + $0x7] ss:$8 sm:$0xf]  ;;  %v1252_v25 = vpop.permute.xlu0 %1251 }
 0x4f1   : > { %v1181_v53 = vadd.f32 %v1180_v52, %v1178_v51  ;;  %v1325_v46 = vld [vmem:[#allocation19 + $0x28] sm:$0xff]  ;;  %v1327_v48 = vld [vmem:[#allocation19 + $0x38] sm:$0xff] }
 0x4f2   : > { %v2204_v47 = vpack.c.bf16 %v1325_v46, %v1324_v44  ;;  %v1937_v51 = vld [vmem:[#allocation17] ss:$0 sm:$0xff]  ;;  %v1527_v44 = vld [vmem:[#allocation23] sm:$0xff]  ;;  %v1528_v46 = vld [vmem:[#allocation23 + $0x8] sm:$0xff] }
 0x4f3   : > { %v1186_v55 = vmul.f32 %v1185_v54, %v1181_v53  ;;  %1182 = vst.msk [vmem:[#allocation4 + $0x1] ss:$8 sm:$0xf] %vm3817_vm5, %v1181_v53  ;;  %v1243_v45 = vmul.f32 %v1937_v51, %v3767_v9  ;;  %v1532_v51 = vld [vmem:[#allocation23 + $0x28] sm:$0xff] }
 0x4f4   : > { %2205 = vmatpush3.bf16.msra.mxu1 %v2204_v47  ;;  %v1529_v47 = vld [vmem:[#allocation23 + $0x10] sm:$0xff] }
 0x4f5   : > { %v1189_v57 = vadd.f32 %v1188_v56, %v1186_v55  ;;  %v1268_v28 = vpop.permute.xlu1 %1267  ;;  %v1300_v33 = vpop.permute.xlu0 %1299  ;;  %2206 = vmatprep.subr.bf16.mxu1 %v3132_v0 }
 0x4f7   : > { %v1194_v59 = vmul.f32 %v1193_v58, %v1189_v57  ;;  %1190 = vst.msk [vmem:[#allocation4 + $0x2] ss:$8 sm:$0xf] %vm3817_vm5, %v1189_v57 }
 0x4f9   : > { %v1197_v62 = vadd.f32 %v1196_v60, %v1194_v59 }
 0x4fa   : > { %v1284_v38 = vpop.permute.xlu1 %1283  ;;  %v1278_v55 = vpop.permute.xlu0 %1277 }
 0x4fb   : > { %v1202_v2 = vmul.f32 %v1201_v63, %v1197_v62  ;;  %1198 = vst.msk [vmem:[#allocation4 + $0x3] ss:$8 sm:$0xf] %vm3817_vm5, %v1197_v62 }
 0x4fd   : > { %v1205_v5 = vadd.f32 %v1204_v3, %v1202_v2 }
 0x4ff   : > { %v1210_v7 = vmul.f32 %v1209_v6, %v1205_v5  ;;  %1206 = vst.msk [vmem:[#allocation4 + $0x4] ss:$8 sm:$0xf] %vm3817_vm5, %v1205_v5  ;;  %v1246_v50 = vpop.permute.xlu1 %1245 }
 0x501   : > { %v1213_v10 = vadd.f32 %v1212_v8, %v1210_v7 }
 0x503   : > { %v1218_v13 = vmul.f32 %v1217_v12, %v1213_v10  ;;  %1214 = vst.msk [vmem:[#allocation4 + $0x5] ss:$8 sm:$0xf] %vm3817_vm5, %v1213_v10 }
 0x504   : > { %v1262_v53 = vpop.permute.xlu1 %1261 }
 0x505   : > { %v1221_v15 = vadd.f32 %v1220_v14, %v1218_v13 }
 0x507   : > { %v1226_v17 = vmul.f32 %v1225_v16, %v1221_v15  ;;  %1222 = vst.msk [vmem:[#allocation4 + $0x6] ss:$8 sm:$0xf] %vm3817_vm5, %v1221_v15  ;;  %v1433_v15 = vld [vmem:[#allocation20] sm:$0xff]  ;;  %v1434_v16 = vld [vmem:[#allocation20 + $0x8] sm:$0xff] }
 0x509   : > { %v1229_v19 = vadd.f32 %v1228_v18, %v1226_v17  ;;  %v1435_v17 = vld [vmem:[#allocation20 + $0x10] sm:$0xff]  ;;  %v2210_v18 = vpack.c.bf16 %v1434_v16, %v1433_v15  ;;  %v1941_v15 = vld [vmem:[#allocation22] ss:$0 sm:$0xff] }
 0x50b   : > { %1230 = vst.msk [vmem:[#allocation4 + $0x7] ss:$8 sm:$0xf] %vm3817_vm5, %v1229_v19  ;;  %v1436_v19 = vld [vmem:[#allocation20 + $0x18] sm:$0xff]  ;;  %2211 = vmatpush3.bf16.msra.mxu0 %v2210_v18 }
 0x50c   : > { %v2213_v20 = vpack.c.bf16 %v1436_v19, %v1435_v17  ;;  %2212 = vmatprep.subr.bf16.mxu0 %v3132_v0  ;;  %v1942_v19 = vld [vmem:[#allocation25] ss:$0 sm:$0xff] }
 0x50f   : > { %2214 = vmatpush3.bf16.msra.mxu0 %v2213_v20 }
 0x510   : > { %2215 = vmatprep.subr.bf16.mxu0 %v3132_v0 }
 0x512   : > { %v1232_v27 = vld [vmem:[#allocation4] sm:$0xff]  ;;  %v1233_v29 = vld [vmem:[#allocation4 + $0x8] sm:$0xff]  ;;  %v1235_v32 = vld [vmem:[#allocation4 + $0x18] sm:$0xff] }
 0x513   : > { %v1254_v30 = vmul.f32 %v1252_v25, %v1232_v27  ;;  %v1270_v31 = vmul.f32 %v1268_v28, %v1233_v29  ;;  %v1302_v34 = vmul.f32 %v1300_v33, %v1235_v32  ;;  %v1234_v35 = vld [vmem:[#allocation4 + $0x10] sm:$0xff]  ;;  %v1248_v52 = vmul.f32 %v1246_v50, %v1232_v27  ;;  %2217 = vmatpush3.bf16.msra.mxu0 %v2216_v23  ;;  %v1531_v50 = vld [vmem:[#allocation23 + $0x20] sm:$0xff] }
 0x514   : > { %v1286_v40 = vmul.f32 %v1284_v38, %v1234_v35  ;;  %v1264_v57 = vmul.f32 %v1262_v53, %v1233_v29  ;;  %v1280_v61 = vmul.f32 %v1278_v55, %v1234_v35  ;;  %2218 = vmatprep.subr.bf16.mxu0 %v3132_v0  ;;  %v1439_v29 = vld [vmem:[#allocation20 + $0x30] sm:$0xff]  ;;  %v1442_v33 = vld [vmem:[#allocation20 + $0x48] sm:$0xff]  ;;  %v1444_v35 = vld [vmem:[#allocation20 + $0x58] sm:$0xff] }
 0x515   : > { %1272 = vrot.lane.b32.xlu0 %v1270_v31, %s3145_s0  ;;  %1256 = vrot.lane.b32.xlu1 %v1254_v30, %s3145_s0  ;;  %v1249_v54 = vadd.f32 %v1248_v52, %v1243_v45  ;;  %v1440_v30 = vld [vmem:[#allocation20 + $0x38] sm:$0xff]  ;;  %v1441_v31 = vld [vmem:[#allocation20 + $0x40] sm:$0xff]  ;;  %v1446_v38 = vld [vmem:[#allocation20 + $0x68] sm:$0xff]  ;;  %v2240_v52 = vpack.c.bf16 %v1532_v51, %v1531_v50 }
 0x516   : > { %v2228_v39 = vpack.c.bf16 %v1446_v38, %v1445_v37  ;;  %v1533_v53 = vld [vmem:[#allocation23 + $0x30] sm:$0xff]  ;;  %v1534_v45 = vld [vmem:[#allocation23 + $0x38] sm:$0xff]  ;;  %v1535_v55 = vld [vmem:[#allocation23 + $0x40] sm:$0xff] }
 0x519   : > { %1304 = vrot.lane.b32.xlu0 %v1302_v34, %s3145_s0  ;;  %1293 = vperm.xlu1 %2501, %v3773_v11   ;;  %v1326_v11 = vld [vmem:[#allocation19 + $0x30] sm:$0xff] }
 0x51a   : > { %v2207_v49 = vpack.c.bf16 %v1327_v48, %v1326_v11  ;;  %v1443_v34 = vld [vmem:[#allocation20 + $0x50] sm:$0xff]  ;;  %v2234_v11 = vpack.c.bf16 %v1528_v46, %v1527_v44  ;;  %v1530_v48 = vld [vmem:[#allocation23 + $0x18] sm:$0xff] }
 0x51b   : > { %v2225_v36 = vpack.c.bf16 %v1444_v35, %v1443_v34  ;;  %v1944_v34 = vld [vmem:[#allocation31] ss:$0 sm:$0xff] }
 0x51c   : > { %2208 = vmatpush3.bf16.msra.mxu1 %v2207_v49  ;;  %v2237_v49 = vpack.c.bf16 %v1530_v48, %v1529_v47 }
 0x51d   : > { %1288 = vrot.lane.b32.xlu1 %v1286_v40, %s3145_s0  ;;  %2233 = vmatprep.subr.bf16.mxu1 %v3132_v0  ;;  %v1447_v40 = vld [vmem:[#allocation20 + $0x70] sm:$0xff] }
 0x521   : > { %1316 = vrot.lane.b32.xlu1 %v1314_v43, %s3145_s0  ;;  %v2231_v43 = vpack.c.bf16 %v1448_v42, %v1447_v40  ;;  %s3019_s0 = scalar_lea.vmem %s3018_s2, 256 }
 0x522   : > { %p3021_p9 = scmp.lt.s32.totalorder %s3019_s0, %s3013_s17 }
 0x524   : > { %p3022_p12 = por %p3021_p9, %p3020_p6 }
 0x526   : > { %p3023_p13 = pnand %p3022_p12, %p3016_p7 }
 0x587   : > { %v1257_v56 = vpop.permute.xlu1 %1256  ;;  %v1273_v60 = vpop.permute.xlu0 %1272 }
 0x588   : > { %v1259_v58 = vadd.f32 %v1257_v56, %v1249_v54  ;;  %v2243_v54 = vpack.c.bf16 %v1534_v45, %v1533_v53  ;;  %v1536_v56 = vld [vmem:[#allocation23 + $0x48] sm:$0xff] }
 0x58a   : > { %v1265_v59 = vadd.f32 %v1264_v57, %v1259_v58  ;;  %v2246_v57 = vpack.c.bf16 %v1536_v56, %v1535_v55  ;;  %v1537_v58 = vld [vmem:[#allocation23 + $0x50] sm:$0xff] }
 0x58b   : > { %v1305_v7 = vpop.permute.xlu0 %1304 }
 0x58c   : > { %v1275_v62 = vadd.f32 %v1273_v60, %v1265_v59  ;;  %v1538_v59 = vld [vmem:[#allocation23 + $0x58] sm:$0xff] }
 0x58d   : > { %v2249_v60 = vpack.c.bf16 %v1538_v59, %v1537_v58 }
 0x58e   : > { %v1281_v63 = vadd.f32 %v1280_v61, %v1275_v62  ;;  %v1539_v61 = vld [vmem:[#allocation23 + $0x60] sm:$0xff]  ;;  %v1540_v62 = vld [vmem:[#allocation23 + $0x68] sm:$0xff] }
 0x598   : > { %v1294_v2 = vpop.permute.xlu1 %1293 }
 0x599   : > { %v1296_v4 = vmul.f32 %v1294_v2, %v1235_v32  ;;  %v2219_v32 = vpack.c.bf16 %v1440_v30, %v1439_v29 }
 0x59b   : > { %2220 = vmatpush3.bf16.msra.mxu0 %v2219_v32 }
 0x59c   : > { %v1289_v3 = vpop.permute.xlu1 %1288  ;;  %2221 = vmatprep.subr.bf16.mxu0 %v3132_v0 }
 0x59d   : > { %v1291_v5 = vadd.f32 %v1289_v3, %v1281_v63  ;;  %v2252_v63 = vpack.c.bf16 %v1540_v62, %v1539_v61 }
 0x59f   : > { %v1297_v6 = vadd.f32 %v1296_v4, %v1291_v5 }
 0x5a0   : > { %v1317_v10 = vpop.permute.xlu1 %1316 }
 0x5a1   : > { %v1307_v8 = vadd.f32 %v1305_v7, %v1297_v6  ;;  %v1939_v6 = vld [vmem:[#allocation26] ss:$0 sm:$0xff] }
 0x5a3   : > { %v1319_v12 = vmul.f32 %v1317_v10, %v1307_v8  ;;  %v1940_v8 = vld [vmem:[#allocation28] ss:$0 sm:$0xff] }
 0x5a5   : > { %2089 = vmatmul.mubr.msk.f32.vlgmr.msra.gmra.mrb[2].mxu1 %vm877_vm2, %v1319_v12 }
 0x5a6   : > { %2158 = vmatprep.mubr.msk.f32.mxu1 %vm3133_vm1, %v3134_v1  ;;  %v3858_v1 = vand.u32 127, %v862_v41  ;;  %v2222_v41 = vpack.c.bf16 %v1442_v33, %v1441_v31  ;;  %2235 = vmatpush3.bf16.msra.mxu1 %v2234_v11  ;;  %v1943_v33 = vld [vmem:[#allocation29] ss:$0 sm:$0xff] }
 0x5a7   : > { %2236 = vmatprep.subr.bf16.mxu1 %v3132_v0 }
 0x5a8   : > { %vm1410_vm6 = vcmp.lt.s32.totalorder %v3858_v1, 32  ;;  %2223 = vmatpush3.bf16.msra.mxu0 %v2222_v41 }
 0x5a9   : > { %2224 = vmatprep.subr.bf16.mxu0 %v3132_v0 }
 0x5aa   : > { %2238 = vmatpush3.bf16.msra.mxu1 %v2237_v49 }
 0x5ab   : > { %2239 = vmatprep.subr.bf16.mxu1 %v3132_v0 }
 0x5ac   : > { %2226 = vmatpush3.bf16.msra.mxu0 %v2225_v36 }
 0x5ad   : > { %2227 = vmatprep.subr.bf16.mxu0 %v3132_v0 }
 0x5ae   : > { %2241 = vmatpush3.bf16.msra.mxu1 %v2240_v52 }
 0x5af   : > { %2242 = vmatprep.subr.bf16.mxu1 %v3132_v0 }
 0x5b0   : > { %2229 = vmatpush3.bf16.msra.mxu0 %v2228_v39 }
 0x5b1   : > { %2230 = vmatprep.subr.bf16.mxu0 %v3132_v0 }
 0x5b2   : > { %2244 = vmatpush3.bf16.msra.mxu1 %v2243_v54 }
 0x5b3   : > { %2245 = vmatprep.subr.bf16.mxu1 %v3132_v0 }
 0x5b4   : > { %2232 = vmatpush3.bf16.msra.mxu0 %v2231_v43 }
 0x5b6   : > { %2247 = vmatpush3.bf16.msra.mxu1 %v2246_v57 }
 0x5b7   : > { %2248 = vmatprep.subr.bf16.mxu1 %v3132_v0 }
 0x5ba   : > { %2250 = vmatpush3.bf16.msra.mxu1 %v2249_v60 }
 0x5bb   : > { %2251 = vmatprep.subr.bf16.mxu1 %v3132_v0 }
 0x5be   : > { %2253 = vmatpush3.bf16.msra.mxu1 %v2252_v63 }
 0x5bf   : > { %2254 = vmatprep.subr.bf16.mxu1 %v3132_v0 }
 0x678   : > { %v1397_v9 = vpop.f32.mrb[2].mxu1 }
 0x679   : > { %v1401_v13 = vadd.f32 %v1397_v9, %v3751_v26  ;;  %v2090_v14 = vpop.f32.mrb[3].mxu1  ;;  %v1541_v9 = vld [vmem:[#allocation23 + $0x70] sm:$0xff] }
 0x67b   : > { %1404 = vadd.xlane.f32.xlu0 %v1401_v13 }
 0x708   : > { %v1405_v26 = vpop.xlane.xlu0 %1404 }
 0x709   : > { %v1406_v24 = vmul.f32 0.03125, %v1405_v26 }
 0x70b   : > { %v1407_v25 = vsub.f32 %v1401_v13, %v1406_v24  ;;  %v1542_v13 = vld [vmem:[#allocation23 + $0x78] sm:$0xff] }
 0x70c   : > { %v2255_v14 = vpack.c.bf16 %v1542_v13, %v1541_v9 }
 0x70d   : > { %v3863_v27 = vsel %vm1410_vm6, %v1407_v25, 0.0 }
 0x70e   : > { %v1412_v28 = vmul.f32 %v3863_v27, %v3863_v27  ;;  %2256 = vmatpush3.bf16.msra.mxu1 %v2255_v14 }
 0x710   : > { %1413 = vadd.xlane.f32.xlu1 %v1412_v28 }
 0x79d   : > { %v1414_v2 = vpop.xlane.xlu1 %1413 }
 0x79e   : > { %v1415_v3 = vmul.f32 0.03125, %v1414_v2 }
 0x7a0   : > { %v1416_v4 = vadd.f32 1e-05, %v1415_v3 }
 0x7a2   : > { %2531 = vrsqrt.f32 %v1416_v4 }
 0x7ac   : > { %v2532_v5 = vpop.eup %2531 }
 0x7ad   : > { %v1418_v7 = vmul.f32 %v2532_v5, %v3863_v27 }
 0x7af   : > { %v1425_v10 = vmul.f32 %v1939_v6, %v1418_v7 }
 0x7b1   : > { %v1432_v12 = vadd.f32 %v1940_v8, %v1425_v10 }
 0x7b3   : > { %2124 = vmatmul.mubr.f32.vlgmr.msra.gmra.mrb[2].mxu0 %v1432_v12 }
 0x886   : > { %v1522_v16 = vpop.f32.mrb[2].mxu0 }
 0x887   : > { %v1523_v17 = vadd.f32 %v1941_v15, %v1522_v16  ;;  %v2125_v0 = vpop.f32.mrb[3].mxu0 }
 0x889   : > { %v1526_v18 = vmax.f32 %v1523_v17, 0.0 }
 0x88b   : > { %2159 = vmatmul.mubr.f32.vlgmr.msra.gmra.mrb[4].mxu1 %v1526_v18 }
 0x95e   : > { %v1616_v20 = vpop.f32.mrb[4].mxu1 }
 0x95f   : > { %v1617_v21 = vadd.f32 %v1942_v19, %v1616_v20  ;;  %v2160_v22 = vpop.f32.mrb[5].mxu1 }
 0x961   : > { %v1620_v23 = vadd.f32 %v1617_v21, %v1432_v12 }
 0x963   : > { %1623 = vadd.xlane.f32.xlu0 %v1620_v23 }
 0x9f0   : > { %v1624_v26 = vpop.xlane.xlu0 %1623 }
 0x9f1   : > { %v1625_v24 = vmul.f32 0.03125, %v1624_v26 }
 0x9f3   : > { %v1626_v25 = vsub.f32 %v1620_v23, %v1625_v24 }
 0x9f5   : > { %v1627_v27 = vsel %vm1410_vm6, %v1626_v25, 0.0 }
 0x9f6   : > { %v1628_v28 = vmul.f32 %v1627_v27, %v1627_v27 }
 0x9f8   : > { %1629 = vadd.xlane.f32.xlu0 %v1628_v28 }
 0xa85   : > { %v1630_v29 = vpop.xlane.xlu0 %1629 }
 0xa86   : > { %v1631_v30 = vmul.f32 0.03125, %v1630_v29 }
 0xa88   : > { %v1632_v31 = vadd.f32 1e-05, %v1631_v30 }
 0xa8a   : > { %2533 = vrsqrt.f32 %v1632_v31 }
 0xa94   : > { %v2534_v32 = vpop.eup %2533 }
 0xa95   : > { %v1634_v41 = vmul.f32 %v2534_v32, %v1627_v27 }
 0xa97   : > { %v1641_v35 = vmul.f32 %v1943_v33, %v1634_v41 }
 0xa99   : > { %v1648_v36 = vadd.f32 %v1944_v34, %v1641_v35 }
 0xa9b   : > { %1649 = vst [vmem:[%s773_s21] sm:$0xff] %v1648_v36 }
 0xa9c   : > { %3026 = shalt.err (!%p3023_p13)
}
 0xa9d   : > { %s3027_s24 = scalar_lea.hbm %s3887_s18, 128  ;;  %s3031_s20 = scalar_lea.hbm %s4021_s3, 256 }
 0xa9e   : > { %p3028_p1 = scmp.ne.s32.totalorder %s3887_s18, %s3027_s24  ;;  %p3032_p0 = scmp.lt.u32.totalorder %s3887_s18, %s4021_s3 }
 0xa9f   : > { %p3033_p4 = scmp.lt.u32.totalorder %s3031_s20, %s3027_s24  ;;  %p3035_p11 = scmp.lt.u32.totalorder %s3027_s24, %s3887_s18 }
 0xaa0   : > { %p3029_p3 = pnand %p3028_p1, %p4022_p8 }
 0xaa1   : > { %p3034_p10 = por %p3033_p4, %p3032_p0 }
 0xaa2   : > { %p3030_p2 = pneg %p3029_p3 }
 0xaa3   : > { %p3036_p5 = por %p3035_p11, %p3034_p10 }
 0xaa5   : > { %p3037_p7 = pnand %p3036_p5, %p3030_p2 }
 0xaa7   : > { %3040 = shalt.err (!%p3037_p7)
}
 0xaa8   : > { %2323 = dma.vmem_to_hbm [thread:$0]  (%p4022_p8), %s3889_s16, 128, %s3887_s18, %s1651_s19  }
 0xaa9 PF: > { %s4023_s17 = sld [smem:[#allocation43_spill]]  ;;  %s4024_s2 = sld [smem:[#allocation46_spill]] }
 0xaaa   : > { %p4025_p6 = scmp.ne.s32.totalorder %s3996_s29, 0 }
 0xaaf   : > { %s1676_s0 = sand.u32 1, %s4023_s17   ;;  %p4026_p9 = scmp.ge.s32.totalorder %s4024_s2, 2 }
 0xab0   : > { %s1677_s25 = scalar_lea.sflag [#allocation7], %s1676_s0 }
 0xab1   : > { %p2379_p12 = pnand %p4026_p9, %p4025_p6 }
 0xab3   : > { %3094 = dma.done.wait (!%p2379_p12), %s1677_s25, 128  }
 0xab4   : > { %3096 = vsyncadd (!%p2379_p12), %s1677_s25, 4294967168  ;;  %s4027_s24 = sld [smem:[#allocation44_spill]]  ;;  %s4028_s25 = sld [smem:[#allocation45_spill]] }
 0xab5   : > { %p38_p13 = scmp.ge.s32.totalorder %s3616_s1, 4   ;;  %s4029_s26 = smov %s3627_s23 }
 0xab6   : > { %s4030_s27 = smov %s3616_s1 }
 0xab7   :  { %40 = sbr.rel (!%p38_p13) target bundleno = 20 (0x14), region = 211 }
 0xabe   :  { %1682 = vsyncpa [#allocation6], 1 }
 0xabf   :  { %1684 = vsyncpa [#allocation6 + $0x1], 1 }
 0xac0   :  { %1685 = vsyncpa [#allocation9], 1 }
 0xac1   :  { %1686 = vsyncpa [#allocation12], 1 }
 0xac2   :  { %1687 = vsyncpa [#allocation15], 1 }
 0xac3   :  { %1688 = vsyncpa [#allocation18], 1 }
 0xac4   :  { %1689 = vsyncpa [#allocation21], 1 }
 0xac5   :  { %1690 = vsyncpa [#allocation24], 1 }
 0xac6   :  { %1691 = vsyncpa [#allocation27], 1 }
 0xac7   :  { %1692 = vsyncpa [#allocation30], 1 }
 0xac8   :  { %1693 = vsyncpa [#allocation7], 1 }
 0xac9   :  { %1695 = vsyncpa [#allocation7 + $0x1], 1 }

</bundles_post_ra>
